<compile_context>
chip_gen: v7x
topology: tpu7x:2x2x1
jax: 0.10.0
libtpu: 0.0.40
codegen_flags: <defaults>
</compile_context>

<pallas_src>
import jax
import jax.numpy as jnp
import numpy as np
from jax.experimental import pallas as pl
from jax.experimental.pallas import tpu as pltpu

IMG_SHAPE = (1, 28, 28)
N_CLASSES = 10
IMG_DIM = int(np.prod(IMG_SHAPE))        # 784
IN_DIM = N_CLASSES + IMG_DIM             # 794
HIDDEN = 512
OUT_DIM = 1

N_CLS_PAD = 16                           # sublane-friendly pad of the class axis
OUT_PAD = 128                            # lane-dense output slab


def _leaky_relu(x, slope=0.2):
    return jnp.where(x > 0, x, slope * x)


def discriminator_kernel(x_ref, oh_ref, w1_ref, ep_ref, b1_ref,
                         w2_ref, b2_ref, w3_ref, b3_ref, w4_ref, b4_ref,
                         o_ref):
    """Fused MLP: (784 img + 10 emb) -> 512 -> 512 -> 512 -> 1 (padded to 128).

    All matmuls are bf16 x bf16 -> f32 (MXU-native); bias adds / LeakyReLU in f32.
    """
    x = x_ref[...].astype(jnp.bfloat16)                      # (TB, 784) bf16

    # Layer 1 (split-K: image part + fused label-embedding part).
    h = jnp.dot(x, w1_ref[...], preferred_element_type=jnp.float32)
    h = h + jnp.dot(oh_ref[...], ep_ref[...],
                    preferred_element_type=jnp.float32)
    h = _leaky_relu(h + b1_ref[...])

    # Layer 2 (+ Dropout(0.4) -> identity in eval mode).
    h = jnp.dot(h.astype(jnp.bfloat16), w2_ref[...],
                preferred_element_type=jnp.float32) + b2_ref[...]
    h = _leaky_relu(h)

    # Layer 3 (+ Dropout(0.4) -> identity in eval mode).
    h = jnp.dot(h.astype(jnp.bfloat16), w3_ref[...],
                preferred_element_type=jnp.float32) + b3_ref[...]
    h = _leaky_relu(h)

    # Output layer, padded to 128 lanes for an unmasked full-lane store.
    o_ref[...] = jnp.dot(h.astype(jnp.bfloat16), w4_ref[...],
                         preferred_element_type=jnp.float32) + b4_ref[...]


def init_params(key):
    """Deterministic synthetic parameters matching the PyTorch module shapes (f32)."""
    ks = jax.random.split(key, 9)

    def linear(kw, fan_in, fan_out):
        bound = 1.0 / np.sqrt(fan_in)
        w = jax.random.uniform(kw, (fan_in, fan_out), jnp.float32, -bound, bound)
        b = jax.random.uniform(jax.random.fold_in(kw, 1), (1, fan_out),
                               jnp.float32, -bound, bound)
        return w, b

    emb = jax.random.normal(ks[0], (N_CLASSES, N_CLASSES), jnp.float32)  # Embedding(10,10)
    w1, b1 = linear(ks[1], IN_DIM, HIDDEN)
    w2, b2 = linear(ks[2], HIDDEN, HIDDEN)
    w3, b3 = linear(ks[3], HIDDEN, HIDDEN)
    w4, b4 = linear(ks[4], HIDDEN, OUT_DIM)
    return dict(emb=emb, w1=w1, b1=b1, w2=w2, b2=b2, w3=w3, b3=b3, w4=w4, b4=b4)


def prepare_params(params):
    """One-time deployment prep (NOT on the per-call path).

    - bf16 weight storage (f32 accumulation in-kernel)
    - split W1 into image rows (bf16) and label rows folded with the embedding
      table into a per-class projection table emb_proj (bf16, 16x512)
    - W4/b4 zero-padded to 128 lane-dense output columns
    """
    w1_img = params["w1"][:IMG_DIM, :].astype(jnp.bfloat16)     # (784, 512) bf16
    w1_lbl = params["w1"][IMG_DIM:, :]                          # (10, 512)  f32
    emb_proj = params["emb"] @ w1_lbl                           # (10, 512)  f32
    emb_proj_pad = (jnp.zeros((N_CLS_PAD, HIDDEN), jnp.float32)
                    .at[:N_CLASSES].set(emb_proj)
                    .astype(jnp.bfloat16))                      # (16, 512) bf16

    w4_pad = jnp.zeros((HIDDEN, OUT_PAD), jnp.bfloat16).at[:, :OUT_DIM].set(
        params["w4"].astype(jnp.bfloat16))
    b4_pad = jnp.zeros((1, OUT_PAD), jnp.float32).at[:, :OUT_DIM].set(params["b4"])

    return dict(
        w1_img=w1_img, emb_proj=emb_proj_pad, b1=params["b1"],
        w2=params["w2"].astype(jnp.bfloat16), b2=params["b2"],
        w3=params["w3"].astype(jnp.bfloat16), b3=params["b3"],
        w4=w4_pad, b4=b4_pad,
    )


def _batch_tile(B):
    """Pick the batch tile. Weights stay VMEM-resident across tiles.

    - B <= 256: single tile (smallest launch overhead).
    - 256 < B <= 1024: >=2 tiles so both v7x TensorCores get work under
      dimension_semantics=("parallel",); tile rounded up to a multiple of 8.
    - B > 1024: 512-row tiles amortize the ~0.35us per-grid-step overhead while
      keeping x/out/activation buffers small enough for v7x's 64 MiB VMEM.
    """
    if B <= 256:
        return B
    if B <= 1024:
        return min(512, (((B + 1) // 2 + 7) // 8) * 8)
    return 512


@jax.jit
def discriminator_forward(prep, img, labels):
    """img: (B, 1, 28, 28) f32 NCHW; labels: (B,) int32. Returns (B, 1) f32."""
    B = img.shape[0]
    x = img.reshape(B, IMG_DIM)                                 # (B, 784), free reshape
    # One-hot built in the wrapper (cheap XLA op) so the kernel never sees a
    # degenerate (TB, 1) int32 block.  Labels >= N_CLASSES give zero embedding.
    onehot = (labels.reshape(B, 1).astype(jnp.int32) ==
              jnp.arange(N_CLS_PAD, dtype=jnp.int32)[None, :]).astype(jnp.bfloat16)

    TB = _batch_tile(B)
    grid = (pl.cdiv(B, TB),)

    # NOTE: the image/K dim stays at 784 (== full array dim, so legal); padding
    # it to 896 would cost an extra activation copy in the wrapper for a few-%
    # MXU win on the first matmul -- skipped.
    out = pl.pallas_call(
        discriminator_kernel,
        out_shape=jax.ShapeDtypeStruct((B, OUT_PAD), jnp.float32),
        grid_spec=pltpu.PrefetchScalarGridSpec(
            num_scalar_prefetch=0,
            grid=grid,
            in_specs=[
                pl.BlockSpec((TB, IMG_DIM), lambda i: (i, 0)),       # img block (f32)
                pl.BlockSpec((TB, N_CLS_PAD), lambda i: (i, 0)),     # one-hot (bf16)
                pl.BlockSpec((IMG_DIM, HIDDEN), lambda i: (0, 0)),   # W1_img (bf16)
                pl.BlockSpec((N_CLS_PAD, HIDDEN), lambda i: (0, 0)), # emb_proj (bf16)
                pl.BlockSpec((1, HIDDEN), lambda i: (0, 0)),         # b1 (f32)
                pl.BlockSpec((HIDDEN, HIDDEN), lambda i: (0, 0)),    # W2 (bf16)
                pl.BlockSpec((1, HIDDEN), lambda i: (0, 0)),         # b2 (f32)
                pl.BlockSpec((HIDDEN, HIDDEN), lambda i: (0, 0)),    # W3 (bf16)
                pl.BlockSpec((1, HIDDEN), lambda i: (0, 0)),         # b3 (f32)
                pl.BlockSpec((HIDDEN, OUT_PAD), lambda i: (0, 0)),   # W4 padded (bf16)
                pl.BlockSpec((1, OUT_PAD), lambda i: (0, 0)),        # b4 padded (f32)
            ],
            out_specs=pl.BlockSpec((TB, OUT_PAD), lambda i: (i, 0)),
        ),
        compiler_params=pltpu.CompilerParams(
            dimension_semantics=("parallel",),
            vmem_limit_bytes=32 * 1024 * 1024),
    )(x, onehot, prep["w1_img"], prep["emb_proj"], prep["b1"],
      prep["w2"], prep["b2"], prep["w3"], prep["b3"], prep["w4"], prep["b4"])

    return out[:, :OUT_DIM]                                     # (B, 1)


def reference_forward_quantized(prep, img, labels):
    """Plain-JAX reference mirroring the kernel's exact numerics
    (bf16 weights AND activations on the MXU, f32 accumulation)."""
    B = img.shape[0]
    x = img.reshape(B, IMG_DIM).astype(jnp.bfloat16)
    onehot = (labels.reshape(B, 1).astype(jnp.int32) ==
              jnp.arange(N_CLS_PAD, dtype=jnp.int32)[None, :]).astype(jnp.bfloat16)
    h = jnp.dot(x, prep["w1_img"], preferred_element_type=jnp.float32)
    h = h + jnp.dot(onehot, prep["emb_proj"], preferred_element_type=jnp.float32)
    h = _leaky_relu(h + prep["b1"])
    h = _leaky_relu(jnp.dot(h.astype(jnp.bfloat16), prep["w2"],
                            preferred_element_type=jnp.float32) + prep["b2"])
    h = _leaky_relu(jnp.dot(h.astype(jnp.bfloat16), prep["w3"],
                            preferred_element_type=jnp.float32) + prep["b3"])
    out = jnp.dot(h.astype(jnp.bfloat16), prep["w4"],
                  preferred_element_type=jnp.float32) + prep["b4"]
    return out[:, :OUT_DIM]


def reference_forward_f32(params, img, labels):
    """Full-precision reference mirroring the PyTorch forward (eval mode)."""
    B = img.shape[0]
    x = jnp.concatenate([img.reshape(B, -1),
                         jnp.take(params["emb"], labels, axis=0)], axis=-1)
    h = _leaky_relu(x @ params["w1"] + params["b1"])
    h = _leaky_relu(h @ params["w2"] + params["b2"])
    h = _leaky_relu(h @ params["w3"] + params["b3"])
    return h @ params["w4"] + params["b4"]


if __name__ == "__main__":
    key = jax.random.PRNGKey(0)
    k_param, k_img, k_lbl = jax.random.split(key, 3)

    params = init_params(k_param)
    prep = prepare_params(params)          # one-time, off the per-call path

    B = 2
    img = jax.random.normal(k_img, (B,) + IMG_SHAPE, jnp.float32)   # (2, 1, 28, 28)
    labels = jax.random.randint(k_lbl, (B,), 0, N_CLASSES, jnp.int32)

    out = discriminator_forward(prep, img, labels)
    out = jax.block_until_ready(out)
    assert out.shape == (B, 1)

    # Tight check against the quantization-matched reference (same bf16 math).
    ref_q = reference_forward_quantized(prep, img, labels)
    np.testing.assert_allclose(np.asarray(out), np.asarray(ref_q),
                               rtol=1e-3, atol=1e-3)

    # Loose sanity check against the full-f32 PyTorch-equivalent forward.
    ref_f32 = reference_forward_f32(params, img, labels)
    np.testing.assert_allclose(np.asarray(out), np.asarray(ref_f32),
                               rtol=1e-1, atol=1e-1)

    print("KERNEL_OK")
</pallas_src>

<mosaic_0001>
module attributes {stable_mosaic.version = 11 : i64} {
  func.func @discriminator_kernel(%arg0: i32, %arg1: memref<2x784xf32, #tpu.memory_space<vmem>>, %arg2: memref<2x16xbf16, #tpu.memory_space<vmem>>, %arg3: memref<784x512xbf16, #tpu.memory_space<vmem>>, %arg4: memref<16x512xbf16, #tpu.memory_space<vmem>>, %arg5: memref<1x512xf32, #tpu.memory_space<vmem>>, %arg6: memref<512x512xbf16, #tpu.memory_space<vmem>>, %arg7: memref<1x512xf32, #tpu.memory_space<vmem>>, %arg8: memref<512x512xbf16, #tpu.memory_space<vmem>>, %arg9: memref<1x512xf32, #tpu.memory_space<vmem>>, %arg10: memref<512x128xbf16, #tpu.memory_space<vmem>>, %arg11: memref<1x128xf32, #tpu.memory_space<vmem>>, %arg12: memref<2x128xf32, #tpu.memory_space<vmem>>) attributes {dimension_semantics = [#tpu.dimension_semantics<parallel>], iteration_bounds = array<i64: 1>, scalar_prefetch = 0 : i64, scratch_operands = 0 : i64, tpu.core_type = #tpu.core_type<tc>, window_params = [{transform_indices = @transform_0, window_bounds = array<i64: 2, 784>}, {transform_indices = @transform_1, window_bounds = array<i64: 2, 16>}, {pipeline_mode = #tpu.pipeline_mode<synchronous>, transform_indices = @transform_2, window_bounds = array<i64: 784, 512>}, {pipeline_mode = #tpu.pipeline_mode<synchronous>, transform_indices = @transform_3, window_bounds = array<i64: 16, 512>}, {pipeline_mode = #tpu.pipeline_mode<synchronous>, transform_indices = @transform_4, window_bounds = array<i64: 1, 512>}, {pipeline_mode = #tpu.pipeline_mode<synchronous>, transform_indices = @transform_5, window_bounds = array<i64: 512, 512>}, {pipeline_mode = #tpu.pipeline_mode<synchronous>, transform_indices = @transform_6, window_bounds = array<i64: 1, 512>}, {pipeline_mode = #tpu.pipeline_mode<synchronous>, transform_indices = @transform_7, window_bounds = array<i64: 512, 512>}, {pipeline_mode = #tpu.pipeline_mode<synchronous>, transform_indices = @transform_8, window_bounds = array<i64: 1, 512>}, {pipeline_mode = #tpu.pipeline_mode<synchronous>, transform_indices = @transform_9, window_bounds = array<i64: 512, 128>}, {pipeline_mode = #tpu.pipeline_mode<synchronous>, transform_indices = @transform_10, window_bounds = array<i64: 1, 128>}, {transform_indices = @transform_11, window_bounds = array<i64: 2, 128>}]} {
    %c0 = arith.constant 0 : index
    %c0_0 = arith.constant 0 : index
    %0 = vector.load %arg1[%c0, %c0_0] : memref<2x784xf32, #tpu.memory_space<vmem>>, vector<2x784xf32>
    %1 = arith.truncf %0 : vector<2x784xf32> to vector<2x784xbf16>
    %c0_1 = arith.constant 0 : index
    %c0_2 = arith.constant 0 : index
    %2 = vector.load %arg3[%c0_1, %c0_2] : memref<784x512xbf16, #tpu.memory_space<vmem>>, vector<784x512xbf16>
    %cst = arith.constant dense<0.000000e+00> : vector<2x512xf32>
    %3 = tpu.matmul %1, %2, %cst {dimension_numbers = #tpu.dot_dimension_numbers<[1], [0], [0], [1], [0, 0, 1, 1], [], []>} : vector<2x784xbf16>, vector<784x512xbf16>, vector<2x512xf32> -> vector<2x512xf32>
    %c0_3 = arith.constant 0 : index
    %c0_4 = arith.constant 0 : index
    %4 = vector.load %arg2[%c0_3, %c0_4] : memref<2x16xbf16, #tpu.memory_space<vmem>>, vector<2x16xbf16>
    %c0_5 = arith.constant 0 : index
    %c0_6 = arith.constant 0 : index
    %5 = vector.load %arg4[%c0_5, %c0_6] : memref<16x512xbf16, #tpu.memory_space<vmem>>, vector<16x512xbf16>
    %cst_7 = arith.constant dense<0.000000e+00> : vector<2x512xf32>
    %6 = tpu.matmul %4, %5, %cst_7 {dimension_numbers = #tpu.dot_dimension_numbers<[1], [0], [0], [1], [0, 0, 1, 1], [], []>} : vector<2x16xbf16>, vector<16x512xbf16>, vector<2x512xf32> -> vector<2x512xf32>
    %7 = arith.addf %3, %6 : vector<2x512xf32>
    %c0_8 = arith.constant 0 : index
    %c0_9 = arith.constant 0 : index
    %8 = vector.load %arg5[%c0_8, %c0_9] : memref<1x512xf32, #tpu.memory_space<vmem>>, vector<1x512xf32>
    %9 = vector.broadcast %8 : vector<1x512xf32> to vector<2x512xf32>
    %10 = arith.addf %7, %9 : vector<2x512xf32>
    %cst_10 = arith.constant 0.000000e+00 : f32
    %11 = vector.broadcast %cst_10 : f32 to vector<2x512xf32>
    %12 = arith.cmpf ogt, %10, %11 : vector<2x512xf32>
    %cst_11 = arith.constant 2.000000e-01 : f32
    %13 = vector.broadcast %cst_11 : f32 to vector<2x512xf32>
    %14 = arith.mulf %13, %10 : vector<2x512xf32>
    %15 = arith.select %12, %10, %14 : vector<2x512xi1>, vector<2x512xf32>
    %16 = arith.truncf %15 : vector<2x512xf32> to vector<2x512xbf16>
    %c0_12 = arith.constant 0 : index
    %c0_13 = arith.constant 0 : index
    %17 = vector.load %arg6[%c0_12, %c0_13] : memref<512x512xbf16, #tpu.memory_space<vmem>>, vector<512x512xbf16>
    %cst_14 = arith.constant dense<0.000000e+00> : vector<2x512xf32>
    %18 = tpu.matmul %16, %17, %cst_14 {dimension_numbers = #tpu.dot_dimension_numbers<[1], [0], [0], [1], [0, 0, 1, 1], [], []>} : vector<2x512xbf16>, vector<512x512xbf16>, vector<2x512xf32> -> vector<2x512xf32>
    %c0_15 = arith.constant 0 : index
    %c0_16 = arith.constant 0 : index
    %19 = vector.load %arg7[%c0_15, %c0_16] : memref<1x512xf32, #tpu.memory_space<vmem>>, vector<1x512xf32>
    %20 = vector.broadcast %19 : vector<1x512xf32> to vector<2x512xf32>
    %21 = arith.addf %18, %20 : vector<2x512xf32>
    %cst_17 = arith.constant 0.000000e+00 : f32
    %22 = vector.broadcast %cst_17 : f32 to vector<2x512xf32>
    %23 = arith.cmpf ogt, %21, %22 : vector<2x512xf32>
    %cst_18 = arith.constant 2.000000e-01 : f32
    %24 = vector.broadcast %cst_18 : f32 to vector<2x512xf32>
    %25 = arith.mulf %24, %21 : vector<2x512xf32>
    %26 = arith.select %23, %21, %25 : vector<2x512xi1>, vector<2x512xf32>
    %27 = arith.truncf %26 : vector<2x512xf32> to vector<2x512xbf16>
    %c0_19 = arith.constant 0 : index
    %c0_20 = arith.constant 0 : index
    %28 = vector.load %arg8[%c0_19, %c0_20] : memref<512x512xbf16, #tpu.memory_space<vmem>>, vector<512x512xbf16>
    %cst_21 = arith.constant dense<0.000000e+00> : vector<2x512xf32>
    %29 = tpu.matmul %27, %28, %cst_21 {dimension_numbers = #tpu.dot_dimension_numbers<[1], [0], [0], [1], [0, 0, 1, 1], [], []>} : vector<2x512xbf16>, vector<512x512xbf16>, vector<2x512xf32> -> vector<2x512xf32>
    %c0_22 = arith.constant 0 : index
    %c0_23 = arith.constant 0 : index
    %30 = vector.load %arg9[%c0_22, %c0_23] : memref<1x512xf32, #tpu.memory_space<vmem>>, vector<1x512xf32>
    %31 = vector.broadcast %30 : vector<1x512xf32> to vector<2x512xf32>
    %32 = arith.addf %29, %31 : vector<2x512xf32>
    %cst_24 = arith.constant 0.000000e+00 : f32
    %33 = vector.broadcast %cst_24 : f32 to vector<2x512xf32>
    %34 = arith.cmpf ogt, %32, %33 : vector<2x512xf32>
    %cst_25 = arith.constant 2.000000e-01 : f32
    %35 = vector.broadcast %cst_25 : f32 to vector<2x512xf32>
    %36 = arith.mulf %35, %32 : vector<2x512xf32>
    %37 = arith.select %34, %32, %36 : vector<2x512xi1>, vector<2x512xf32>
    %38 = arith.truncf %37 : vector<2x512xf32> to vector<2x512xbf16>
    %c0_26 = arith.constant 0 : index
    %c0_27 = arith.constant 0 : index
    %39 = vector.load %arg10[%c0_26, %c0_27] : memref<512x128xbf16, #tpu.memory_space<vmem>>, vector<512x128xbf16>
    %cst_28 = arith.constant dense<0.000000e+00> : vector<2x128xf32>
    %40 = tpu.matmul %38, %39, %cst_28 {dimension_numbers = #tpu.dot_dimension_numbers<[1], [0], [0], [1], [0, 0, 1, 1], [], []>} : vector<2x512xbf16>, vector<512x128xbf16>, vector<2x128xf32> -> vector<2x128xf32>
    %c0_29 = arith.constant 0 : index
    %c0_30 = arith.constant 0 : index
    %41 = vector.load %arg11[%c0_29, %c0_30] : memref<1x128xf32, #tpu.memory_space<vmem>>, vector<1x128xf32>
    %42 = vector.broadcast %41 : vector<1x128xf32> to vector<2x128xf32>
    %43 = arith.addf %40, %42 : vector<2x128xf32>
    %c0_31 = arith.constant 0 : index
    %c0_32 = arith.constant 0 : index
    %44 = vector.load %arg12[%c0_31, %c0_32] : memref<2x128xf32, #tpu.memory_space<vmem>>, vector<2x128xf32>
    tpu.vector_store %arg12[%c0_31, %c0_32], %43 {strides = array<i32>} : memref<2x128xf32, #tpu.memory_space<vmem>>, vector<2x128xf32>,
    return
  }
  func.func @transform_0(%arg0: i32) -> (i32, i32) {
    %c0_i32 = arith.constant 0 : i32
    %c0_i32_0 = arith.constant 0 : i32
    return %arg0, %c0_i32 : i32, i32
  }
  func.func @transform_1(%arg0: i32) -> (i32, i32) {
    %c0_i32 = arith.constant 0 : i32
    %c0_i32_0 = arith.constant 0 : i32
    return %arg0, %c0_i32 : i32, i32
  }
  func.func @transform_2(%arg0: i32) -> (i32, i32) {
    %c0_i32 = arith.constant 0 : i32
    %c0_i32_0 = arith.constant 0 : i32
    %c0_i32_1 = arith.constant 0 : i32
    return %c0_i32, %c0_i32_0 : i32, i32
  }
  func.func @transform_3(%arg0: i32) -> (i32, i32) {
    %c0_i32 = arith.constant 0 : i32
    %c0_i32_0 = arith.constant 0 : i32
    %c0_i32_1 = arith.constant 0 : i32
    return %c0_i32, %c0_i32_0 : i32, i32
  }
  func.func @transform_4(%arg0: i32) -> (i32, i32) {
    %c0_i32 = arith.constant 0 : i32
    %c0_i32_0 = arith.constant 0 : i32
    %c0_i32_1 = arith.constant 0 : i32
    return %c0_i32, %c0_i32_0 : i32, i32
  }
  func.func @transform_5(%arg0: i32) -> (i32, i32) {
    %c0_i32 = arith.constant 0 : i32
    %c0_i32_0 = arith.constant 0 : i32
    %c0_i32_1 = arith.constant 0 : i32
    return %c0_i32, %c0_i32_0 : i32, i32
  }
  func.func @transform_6(%arg0: i32) -> (i32, i32) {
    %c0_i32 = arith.constant 0 : i32
    %c0_i32_0 = arith.constant 0 : i32
    %c0_i32_1 = arith.constant 0 : i32
    return %c0_i32, %c0_i32_0 : i32, i32
  }
  func.func @transform_7(%arg0: i32) -> (i32, i32) {
    %c0_i32 = arith.constant 0 : i32
    %c0_i32_0 = arith.constant 0 : i32
    %c0_i32_1 = arith.constant 0 : i32
    return %c0_i32, %c0_i32_0 : i32, i32
  }
  func.func @transform_8(%arg0: i32) -> (i32, i32) {
    %c0_i32 = arith.constant 0 : i32
    %c0_i32_0 = arith.constant 0 : i32
    %c0_i32_1 = arith.constant 0 : i32
    return %c0_i32, %c0_i32_0 : i32, i32
  }
  func.func @transform_9(%arg0: i32) -> (i32, i32) {
    %c0_i32 = arith.constant 0 : i32
    %c0_i32_0 = arith.constant 0 : i32
    %c0_i32_1 = arith.constant 0 : i32
    return %c0_i32, %c0_i32_0 : i32, i32
  }
  func.func @transform_10(%arg0: i32) -> (i32, i32) {
    %c0_i32 = arith.constant 0 : i32
    %c0_i32_0 = arith.constant 0 : i32
    %c0_i32_1 = arith.constant 0 : i32
    return %c0_i32, %c0_i32_0 : i32, i32
  }
  func.func @transform_11(%arg0: i32) -> (i32, i32) {
    %c0_i32 = arith.constant 0 : i32
    %c0_i32_0 = arith.constant 0 : i32
    return %arg0, %c0_i32 : i32, i32
  }
}

</mosaic_0001>

<bundles_post_ra>
// kernel: discriminator_forward.1
= control target key start
LH: loop header
LB: loop body
LE: loop exit
PB: predicated region body
PF: predicated region fallthrough
CT: control target
= control target key end

     0   :  { %16 = vsyncpa [#allocation3], 0  ;;  %s5764_s0 = inlined_call_operand.vmem [shape: f32[2,784], index: 0, kind: input, shape index: {}]   ;;  %s5765_s1 = inlined_call_operand.vmem [shape: bf16[2,16], index: 1, kind: input, shape index: {}]   ;;  %s5766_s2 = inlined_call_operand.hbm [shape: bf16[784,512], index: 2, kind: input, shape index: {}]   ;;  %s5767_s3 = inlined_call_operand.vmem [shape: bf16[16,512], index: 3, kind: input, shape index: {}]   ;;  %s5768_s4 = inlined_call_operand.vmem [shape: f32[1,512], index: 4, kind: input, shape index: {}]   ;;  %s5769_s5 = inlined_call_operand.hbm [shape: bf16[512,512], index: 5, kind: input, shape index: {}]   ;;  %s5770_s6 = inlined_call_operand.vmem [shape: f32[1,512], index: 6, kind: input, shape index: {}]   ;;  %s5771_s7 = inlined_call_operand.hbm [shape: bf16[512,512], index: 7, kind: input, shape index: {}]   ;;  %s5772_s8 = inlined_call_operand.vmem [shape: f32[1,512], index: 8, kind: input, shape index: {}]   ;;  %s5773_s9 = inlined_call_operand.hbm [shape: bf16[512,128], index: 9, kind: input, shape index: {}]   ;;  %s5774_s10 = inlined_call_operand.vmem [shape: f32[1,128], index: 10, kind: input, shape index: {}]   ;;  %s5775_s11 = inlined_call_operand.vmem [shape: f32[2,128], index: 11, kind: output, shape index: {}]  }
   0x1   :  { %17 = vsyncpa [#allocation5], 0 }
   0x2   :  { %18 = vsyncpa [#allocation8], 0  ;;  %s5479_s17 = smov [#allocation4]   ;;  %s5480_s19 = smov [#allocation2]  }
   0x3   :  { %s44_s18 = sshll.u32 %s5479_s17, 4  ;;  %s28_s20 = sshll.u32 %s5480_s19, 4  ;;  %s45_s18 = int_to_ptr.vmem [resolvable:$true] %s44_s18  ;;  %s5549_s20 = int_to_ptr.vmem [resolvable:$true] %s28_s20 }
   0x4   :  { %s5385_s23 = scalar_lea.hbm %s5769_s5, 16384 }
   0x5   :  { %p5386_p0 = scmp.ne.s32.totalorder %s5769_s5, %s5385_s23  ;;  %p5389_p1 = scmp.lt.u32.totalorder %s5385_s23, %s5769_s5 }
   0x7   :  { %p5391_p2 = pnand %p5389_p1, %p5386_p0 }
   0x9   :  { %5394 = shalt.err (!%p5391_p2)
}
   0xa   :  { %s5395_s28 = scalar_lea.vmem %s45_s18, 16384  ;;  %p5400_p4 = scmp.lt.s32.totalorder %s45_s18, %s45_s18 }
   0xb   :  { %p5396_p3 = scmp.ne.s32.totalorder %s45_s18, %s5395_s28  ;;  %p5401_p5 = scmp.lt.s32.totalorder %s5395_s28, %s5395_s28 }
   0xd   :  { %p5402_p6 = por %p5401_p5, %p5400_p4 }
   0xf   :  { %p5403_p7 = pnand %p5402_p6, %p5396_p3 }
  0x11   :  { %5406 = shalt.err (!%p5403_p7)
}
  0x12   :  { %s5481_s29 = smov 256   ;;  %s5482_s30 = smov 16  }
  0x13   :  { %50 = dma.hbm_to_vmem [thread:$0]  %s5769_s5, 16384, %s45_s18, [#allocation5], %s5481_s29, %s5481_s29, %s5482_s30  }
  0x14   :  { %s5407_s16 = scalar_lea.hbm %s5766_s2, 25088 }
  0x15   :  { %p5408_p8 = scmp.ne.s32.totalorder %s5766_s2, %s5407_s16  ;;  %p5411_p9 = scmp.lt.u32.totalorder %s5407_s16, %s5766_s2 }
  0x17   :  { %p5413_p10 = pnand %p5411_p9, %p5408_p8 }
  0x19   :  { %5416 = shalt.err (!%p5413_p10)
}
  0x1a   :  { %s5417_s23 = scalar_lea.vmem %s5549_s20, 25088  ;;  %p5422_p12 = scmp.lt.s32.totalorder %s5549_s20, %s5549_s20 }
  0x1b   :  { %p5418_p11 = scmp.ne.s32.totalorder %s5549_s20, %s5417_s23  ;;  %p5423_p13 = scmp.lt.s32.totalorder %s5417_s23, %s5417_s23 }
  0x1d   :  { %p5424_p0 = por %p5423_p13, %p5422_p12 }
  0x1f   :  { %p5425_p1 = pnand %p5424_p0, %p5418_p11 }
  0x21   :  { %5428 = shalt.err (!%p5425_p1)
}
  0x22   :  { %34 = dma.hbm_to_vmem [thread:$0]  %s5766_s2, 25088, %s5549_s20, [#allocation3], %s5481_s29, %s5481_s29, %s5482_s30  }
  0x23   :  { %s5483_s24 = smov [#allocation6]   ;;  %s5484_s26 = smov [#allocation7]  }
  0x24   :  { %s58_s25 = sshll.u32 %s5483_s24, 4  ;;  %s72_s27 = sshll.u32 %s5484_s26, 4  ;;  %s59_s25 = int_to_ptr.vmem [resolvable:$true] %s58_s25  ;;  %s5586_s27 = int_to_ptr.vmem [resolvable:$true] %s72_s27 }
  0x25   :  { %s5429_s13 = scalar_lea.hbm %s5771_s7, 16384 }
  0x26   :  { %p5430_p2 = scmp.ne.s32.totalorder %s5771_s7, %s5429_s13  ;;  %p5433_p3 = scmp.lt.u32.totalorder %s5429_s13, %s5771_s7 }
  0x28   :  { %p5435_p4 = pnand %p5433_p3, %p5430_p2 }
  0x2a   :  { %5438 = shalt.err (!%p5435_p4)
}
  0x2b   :  { %s5439_s2 = scalar_lea.vmem %s59_s25, 16384  ;;  %p5444_p6 = scmp.lt.s32.totalorder %s59_s25, %s59_s25 }
  0x2c   :  { %p5440_p5 = scmp.ne.s32.totalorder %s59_s25, %s5439_s2  ;;  %p5445_p7 = scmp.lt.s32.totalorder %s5439_s2, %s5439_s2 }
  0x2e   :  { %p5446_p8 = por %p5445_p7, %p5444_p6 }
  0x30   :  { %p5447_p9 = pnand %p5446_p8, %p5440_p5 }
  0x32   :  { %5450 = shalt.err (!%p5447_p9)
}
  0x33   :  { %64 = dma.hbm_to_vmem [thread:$0]  %s5771_s7, 16384, %s59_s25, [#allocation5], %s5481_s29, %s5481_s29, %s5482_s30  }
  0x34   :  { %s5451_s23 = scalar_lea.hbm %s5773_s9, 4096 }
  0x35   :  { %p5452_p10 = scmp.ne.s32.totalorder %s5773_s9, %s5451_s23  ;;  %p5455_p11 = scmp.lt.u32.totalorder %s5451_s23, %s5773_s9 }
  0x37   :  { %p5457_p12 = pnand %p5455_p11, %p5452_p10 }
  0x39   :  { %5460 = shalt.err (!%p5457_p12)
}
  0x3a   :  { %s5461_s28 = scalar_lea.vmem %s5586_s27, 4096  ;;  %p5466_p0 = scmp.lt.s32.totalorder %s5586_s27, %s5586_s27 }
  0x3b   :  { %p5462_p13 = scmp.ne.s32.totalorder %s5586_s27, %s5461_s28  ;;  %p5467_p1 = scmp.lt.s32.totalorder %s5461_s28, %s5461_s28 }
  0x3d   :  { %p5468_p2 = por %p5467_p1, %p5466_p0 }
  0x3f   :  { %p5469_p3 = pnand %p5468_p2, %p5462_p13 }
  0x41   :  { %5472 = shalt.err (!%p5469_p3)
}
  0x42   :  { %s5485_s7 = smov 64   ;;  %s5486_s29 = smov 4  }
  0x43   :  { %78 = dma.hbm_to_vmem [thread:$0]  %s5773_s9, 4096, %s5586_s27, [#allocation8], %s5485_s7, %s5485_s7, %s5486_s29  }
  0x44   :  { %5473 = dma.done.wait [#allocation3], 25088  }
  0x45   :  { %5474 = vsyncadd [#allocation3], 4294942208 }
  0x46   :  { %5475 = dma.done.wait [#allocation5], 32768  }
  0x47   :  { %5476 = vsyncadd [#allocation5], 4294934528 }
  0x48   :  { %5477 = dma.done.wait [#allocation8], 4096  }
  0x49   :  { %5478 = vsyncadd [#allocation8], 4294963200  ;;  %v5487_v0 = vmov 0   ;;  %v4667_v1 = vld [vmem:[%s5767_s3 + $0x4] ss:$16 sps:$4 sm:$0xff]   ;;  %vm366_vm0 = vcmask 130048   ;;  %v102_v42 = vlaneseq }
  0x4a   :  { %402 = vmatprep.mubr.bf16.mxu0 %v5487_v0  ;;  %443 = vmatprep.mubr.bf16.mxu1 %v5487_v0  ;;  %v4669_v2 = vld [vmem:[%s5767_s3 + $0xc] ss:$16 sps:$4 sm:$0xff]   ;;  %v4671_v3 = vld [vmem:[%s5767_s3] ss:$16 sps:$4 sm:$0xff]   ;;  %v4672_v4 = vld [vmem:[%s5767_s3 + $0x8] ss:$16 sps:$4 sm:$0xff]  }
  0x4b   :  { %370 = vmatprep.subr.bf16.mxu0 %v4667_v1  ;;  %v341_v5 = vld [vmem:[%s5765_s1] sm:$0x1]  ;;  %411 = vmatprep.subr.bf16.mxu1 %v4669_v2  ;;  %v4675_v7 = vld [vmem:[#allocation2 + $0x4] ss:$16 sps:$4 sm:$0xff]   ;;  %v5488_v40 = vmov 1983009808  }
  0x4c   :  { %v4673_v6 = vld [vmem:[#allocation2] ss:$16 sps:$4 sm:$0xff]   ;;  %371 = vmatpush1.bf16.msra.mxu0 %v4671_v3  ;;  %412 = vmatpush1.bf16.msra.mxu1 %v4672_v4  ;;  %v4678_v9 = vld [vmem:[#allocation2 + $0x204] ss:$16 sps:$4 sm:$0xff]   ;;  %v100_v41 = vunpack.c.l.s4 %v5488_v40  ;;  %v5639_v48 = vshrl.u32 %v102_v42, 7 }
  0x4d   :  { %v4676_v8 = vld [vmem:[#allocation2 + $0x200] ss:$16 sps:$4 sm:$0xff]   ;;  %1435 = vmatprep.subr.bf16.mxu0 %v4675_v7  ;;  %v4681_v10 = vld [vmem:[#allocation2 + $0x24] ss:$16 sps:$4 sm:$0xff]   ;;  %1476 = vmatprep.subr.bf16.mxu1 %v4678_v9  ;;  %v4786_v42 = vld [vmem:[#allocation2 + $0x28] ss:$16 sps:$4 sm:$0xff]  }
  0x4e   :  { %v4679_v11 = vld [vmem:[#allocation2 + $0x20] ss:$16 sps:$4 sm:$0xff]   ;;  %v4684_v12 = vld [vmem:[#allocation2 + $0x224] ss:$16 sps:$4 sm:$0xff]   ;;  %v101_v47 = vunpack.c.0.s8 %v100_v41  ;;  %v4788_v41 = vld [vmem:[#allocation2 + $0x2c] ss:$16 sps:$4 sm:$0xff]  }
  0x4f   :  { %4100 = vmatmul.mubr.msk.bf16.vlgmr.msra.gmra.mrb[0].mxu0 %vm366_vm0, %v341_v5  ;;  %4101 = vmatmul.mubr.msk.bf16.vlgmr.msra.gmra.mrb[0].mxu1 %vm366_vm0, %v341_v5  ;;  %v4682_v13 = vld [vmem:[#allocation2 + $0x220] ss:$16 sps:$4 sm:$0xff]   ;;  %v4687_v14 = vld [vmem:[#allocation2 + $0x44] ss:$16 sps:$4 sm:$0xff]  }
  0x50   :  { %1436 = vmatpush1.bf16.msra.mxu0 %v4673_v6  ;;  %1477 = vmatpush1.bf16.msra.mxu1 %v4676_v8  ;;  %v4690_v15 = vld [vmem:[#allocation2 + $0x244] ss:$16 sps:$4 sm:$0xff]   ;;  %v4685_v16 = vld [vmem:[#allocation2 + $0x40] ss:$16 sps:$4 sm:$0xff]   ;;  %v5642_v53 = vsub.s32 %v101_v47, %v5639_v48 }
  0x51   :  { %1437 = vmatprep.subr.bf16.mxu0 %v4681_v10  ;;  %1478 = vmatprep.subr.bf16.mxu1 %v4684_v12  ;;  %v4688_v17 = vld [vmem:[#allocation2 + $0x240] ss:$16 sps:$4 sm:$0xff]   ;;  %v4693_v18 = vld [vmem:[#allocation2 + $0x64] ss:$16 sps:$4 sm:$0xff]  }
  0x52   :  { %v4696_v19 = vld [vmem:[#allocation2 + $0x264] ss:$16 sps:$4 sm:$0xff]   ;;  %v4691_v20 = vld [vmem:[#allocation2 + $0x60] ss:$16 sps:$4 sm:$0xff]  }
  0x53   :  { %v4694_v21 = vld [vmem:[#allocation2 + $0x260] ss:$16 sps:$4 sm:$0xff]   ;;  %v4699_v22 = vld [vmem:[#allocation2 + $0x84] ss:$16 sps:$4 sm:$0xff]  }
  0x54   :  { %1438 = vmatpush1.bf16.msra.mxu0 %v4679_v11  ;;  %1479 = vmatpush1.bf16.msra.mxu1 %v4682_v13  ;;  %v4702_v23 = vld [vmem:[#allocation2 + $0x284] ss:$16 sps:$4 sm:$0xff]   ;;  %v4697_v24 = vld [vmem:[#allocation2 + $0x80] ss:$16 sps:$4 sm:$0xff]  }
  0x55   :  { %1439 = vmatprep.subr.bf16.mxu0 %v4687_v14  ;;  %1480 = vmatprep.subr.bf16.mxu1 %v4690_v15  ;;  %v4700_v25 = vld [vmem:[#allocation2 + $0x280] ss:$16 sps:$4 sm:$0xff]   ;;  %v4705_v26 = vld [vmem:[#allocation2 + $0xa4] ss:$16 sps:$4 sm:$0xff]  }
  0x56   :  { %v4708_v27 = vld [vmem:[#allocation2 + $0x2a4] ss:$16 sps:$4 sm:$0xff]   ;;  %v4703_v28 = vld [vmem:[#allocation2 + $0xa0] ss:$16 sps:$4 sm:$0xff]  }
  0x57   :  { %v4706_v29 = vld [vmem:[#allocation2 + $0x2a0] ss:$16 sps:$4 sm:$0xff]   ;;  %v4711_v30 = vld [vmem:[#allocation2 + $0xc4] ss:$16 sps:$4 sm:$0xff]  }
  0x58   :  { %1440 = vmatpush1.bf16.msra.mxu0 %v4685_v16  ;;  %1481 = vmatpush1.bf16.msra.mxu1 %v4688_v17  ;;  %v4714_v31 = vld [vmem:[#allocation2 + $0x2c4] ss:$16 sps:$4 sm:$0xff]   ;;  %v4709_v32 = vld [vmem:[#allocation2 + $0xc0] ss:$16 sps:$4 sm:$0xff]  }
  0x59   :  { %1441 = vmatprep.subr.bf16.mxu0 %v4693_v18  ;;  %1482 = vmatprep.subr.bf16.mxu1 %v4696_v19  ;;  %v4712_v33 = vld [vmem:[#allocation2 + $0x2c0] ss:$16 sps:$4 sm:$0xff]   ;;  %v4717_v34 = vld [vmem:[#allocation2 + $0xe4] ss:$16 sps:$4 sm:$0xff]   ;;  %v95_v19 = vld [vmem:[%s5764_s0 + $0x8] sm:$0x3f] }
  0x5a   :  { %v4720_v35 = vld [vmem:[#allocation2 + $0x2e4] ss:$16 sps:$4 sm:$0xff]   ;;  %v4715_v36 = vld [vmem:[#allocation2 + $0xe0] ss:$16 sps:$4 sm:$0xff]  }
  0x5b   :  { %v4718_v37 = vld [vmem:[#allocation2 + $0x2e0] ss:$16 sps:$4 sm:$0xff]   ;;  %v4723_v38 = vld [vmem:[#allocation2 + $0x104] ss:$16 sps:$4 sm:$0xff]  }
  0x5c   :  { %1442 = vmatpush1.bf16.msra.mxu0 %v4691_v20  ;;  %1483 = vmatpush1.bf16.msra.mxu1 %v4694_v21  ;;  %v4726_v39 = vld [vmem:[#allocation2 + $0x304] ss:$16 sps:$4 sm:$0xff]   ;;  %v4721_v43 = vld [vmem:[#allocation2 + $0x100] ss:$16 sps:$4 sm:$0xff]   ;;  %v5659_v20 = vrot.slane %v95_v19, %v5642_v53 }
  0x5d   :  { %1443 = vmatprep.subr.bf16.mxu0 %v4699_v22  ;;  %1484 = vmatprep.subr.bf16.mxu1 %v4702_v23  ;;  %v4724_v44 = vld [vmem:[#allocation2 + $0x300] ss:$16 sps:$4 sm:$0xff]   ;;  %v4729_v45 = vld [vmem:[#allocation2 + $0x124] ss:$16 sps:$4 sm:$0xff]  }
  0x5e   :  { %v4732_v46 = vld [vmem:[#allocation2 + $0x324] ss:$16 sps:$4 sm:$0xff]   ;;  %v4727_v49 = vld [vmem:[#allocation2 + $0x120] ss:$16 sps:$4 sm:$0xff]  }
  0x5f   :  { %v4730_v50 = vld [vmem:[#allocation2 + $0x320] ss:$16 sps:$4 sm:$0xff]   ;;  %v4735_v51 = vld [vmem:[#allocation2 + $0x144] ss:$16 sps:$4 sm:$0xff]  }
  0x60   :  { %1444 = vmatpush1.bf16.msra.mxu0 %v4697_v24  ;;  %1485 = vmatpush1.bf16.msra.mxu1 %v4700_v25  ;;  %v4738_v52 = vld [vmem:[#allocation2 + $0x344] ss:$16 sps:$4 sm:$0xff]   ;;  %v4733_v54 = vld [vmem:[#allocation2 + $0x140] ss:$16 sps:$4 sm:$0xff]  }
  0x61   :  { %1445 = vmatprep.subr.bf16.mxu0 %v4705_v26  ;;  %1486 = vmatprep.subr.bf16.mxu1 %v4708_v27  ;;  %v4736_v55 = vld [vmem:[#allocation2 + $0x340] ss:$16 sps:$4 sm:$0xff]   ;;  %v4741_v56 = vld [vmem:[#allocation2 + $0x164] ss:$16 sps:$4 sm:$0xff]   ;;  %v130_v26 = vcombine.high %v5659_v20, %v5659_v20 }
  0x62   :  { %v94_v57 = vld [vmem:[%s5764_s0] sm:$0xff] }
  0x63   :  { %v4744_v58 = vld [vmem:[#allocation2 + $0x364] ss:$16 sps:$4 sm:$0xff]   ;;  %v105_v59 = vrot.slane %v94_v57, %v5642_v53  ;;  %v98_v60 = vcombine.high %v94_v57, %v94_v57  ;;  %v4739_v61 = vld [vmem:[#allocation2 + $0x160] ss:$16 sps:$4 sm:$0xff]  }
  0x64   :  { %1446 = vmatpush1.bf16.msra.mxu0 %v4703_v28  ;;  %1487 = vmatpush1.bf16.msra.mxu1 %v4706_v29  ;;  %v4742_v1 = vld [vmem:[#allocation2 + $0x360] ss:$16 sps:$4 sm:$0xff]   ;;  %v4747_v2 = vld [vmem:[#allocation2 + $0x184] ss:$16 sps:$4 sm:$0xff]  }
  0x65   :  { %1447 = vmatprep.subr.bf16.mxu0 %v4711_v30  ;;  %1488 = vmatprep.subr.bf16.mxu1 %v4714_v31  ;;  %v113_v62 = vcombine.high %v105_v59, %v105_v59  ;;  %v112_v63 = vrot.slane %v98_v60, %v5642_v53  ;;  %v4750_v3 = vld [vmem:[#allocation2 + $0x384] ss:$16 sps:$4 sm:$0xff]   ;;  %v4745_v6 = vld [vmem:[#allocation2 + $0x180] ss:$16 sps:$4 sm:$0xff]   ;;  %v5661_v25 = vpack.c.bf16 %v105_v59, %v105_v59  ;;  %v4810_v59 = vld [vmem:[#allocation2 + $0xa8] ss:$16 sps:$4 sm:$0xff]  }
  0x66   :  { %v4748_v7 = vld [vmem:[#allocation2 + $0x380] ss:$16 sps:$4 sm:$0xff]   ;;  %v4753_v9 = vld [vmem:[#allocation2 + $0x1a4] ss:$16 sps:$4 sm:$0xff]   ;;  %v115_v30 = vcombine.high %v95_v19, %v95_v19 }
  0x67   :  { %v5649_v4 = vpack.c.bf16 %v113_v62, %v113_v62  ;;  %v114_v5 = vcombine.high %v112_v63, %v112_v63  ;;  %v4756_v10 = vld [vmem:[#allocation2 + $0x3a4] ss:$16 sps:$4 sm:$0xff]   ;;  %v4751_v11 = vld [vmem:[#allocation2 + $0x1a0] ss:$16 sps:$4 sm:$0xff]   ;;  %v5665_v27 = vpack.c.bf16 %v112_v63, %v112_v63  ;;  %v4818_v62 = vld [vmem:[#allocation2 + $0xcc] ss:$16 sps:$4 sm:$0xff]  }
  0x68   :  { %1448 = vmatpush1.bf16.msra.mxu0 %v4709_v32  ;;  %1489 = vmatpush1.bf16.msra.mxu1 %v4712_v33  ;;  %v4754_v12 = vld [vmem:[#allocation2 + $0x3a0] ss:$16 sps:$4 sm:$0xff]   ;;  %v4759_v13 = vld [vmem:[#allocation2 + $0x1c4] ss:$16 sps:$4 sm:$0xff]   ;;  %v4781_v32 = vld [vmem:[#allocation2 + $0xc] ss:$16 sps:$4 sm:$0xff]   ;;  %v5668_v33 = vpack.c.bf16 %v130_v26, %v130_v26 }
  0x69   :  { %1449 = vmatprep.subr.bf16.mxu0 %v4717_v34  ;;  %1490 = vmatprep.subr.bf16.mxu1 %v4720_v35  ;;  %v5652_v8 = vpack.c.bf16 %v114_v5, %v114_v5  ;;  %v4762_v14 = vld [vmem:[#allocation2 + $0x3c4] ss:$16 sps:$4 sm:$0xff]   ;;  %v4757_v15 = vld [vmem:[#allocation2 + $0x1c0] ss:$16 sps:$4 sm:$0xff]   ;;  %v129_v35 = vrot.slane %v115_v30, %v5642_v53  ;;  %v4816_v63 = vld [vmem:[#allocation2 + $0xc8] ss:$16 sps:$4 sm:$0xff]  }
  0x6a   :  { %1467 = vmatprep.mubr.bf16.mxu0 %v5649_v4  ;;  %v4760_v16 = vld [vmem:[#allocation2 + $0x3c0] ss:$16 sps:$4 sm:$0xff]   ;;  %v4765_v17 = vld [vmem:[#allocation2 + $0x1e4] ss:$16 sps:$4 sm:$0xff]   ;;  %v4854_v26 = vld [vmem:[#allocation2 + $0x18c] ss:$16 sps:$4 sm:$0xff]  }
  0x6b   :  { %1508 = vmatprep.mubr.bf16.mxu1 %v5652_v8  ;;  %v4768_v18 = vld [vmem:[#allocation2 + $0x3e4] ss:$16 sps:$4 sm:$0xff]   ;;  %v4763_v21 = vld [vmem:[#allocation2 + $0x1e0] ss:$16 sps:$4 sm:$0xff]  }
  0x6c   :  { %1450 = vmatpush1.bf16.msra.mxu0 %v4715_v36  ;;  %1491 = vmatpush1.bf16.msra.mxu1 %v4718_v37  ;;  %v4766_v22 = vld [vmem:[#allocation2 + $0x3e0] ss:$16 sps:$4 sm:$0xff]   ;;  %v4772_v23 = vld [vmem:[#allocation2 + $0x404] ss:$16 sps:$4 sm:$0xff]   ;;  %v4779_v37 = vld [vmem:[#allocation2 + $0x8] ss:$16 sps:$4 sm:$0xff]  }
  0x6d   :  { %1451 = vmatprep.subr.bf16.mxu0 %v4723_v38  ;;  %1492 = vmatprep.subr.bf16.mxu1 %v4726_v39  ;;  %v4775_v24 = vld [vmem:[#allocation2 + $0x604] ss:$16 sps:$4 sm:$0xff]   ;;  %v4770_v28 = vld [vmem:[#allocation2 + $0x400] ss:$16 sps:$4 sm:$0xff]   ;;  %v5674_v39 = vpack.c.bf16 %v129_v35, %v129_v35  ;;  %v4869_v35 = vld [vmem:[#allocation2 + $0x20c] ss:$16 sps:$4 sm:$0xff]  }
  0x6e   :  { %v4773_v29 = vld [vmem:[#allocation2 + $0x600] ss:$16 sps:$4 sm:$0xff]   ;;  %v4778_v31 = vld [vmem:[#allocation2 + $0x424] ss:$16 sps:$4 sm:$0xff]  }
  0x6f   :  { %v4776_v34 = vld [vmem:[#allocation2 + $0x420] ss:$16 sps:$4 sm:$0xff]   ;;  %v4784_v36 = vld [vmem:[#allocation2 + $0x444] ss:$16 sps:$4 sm:$0xff]  }
  0x70   :  { %1452 = vmatpush1.bf16.msra.mxu0 %v4721_v43  ;;  %1493 = vmatpush1.bf16.msra.mxu1 %v4724_v44  ;;  %v4782_v38 = vld [vmem:[#allocation2 + $0x440] ss:$16 sps:$4 sm:$0xff]   ;;  %v4791_v40 = vld [vmem:[#allocation2 + $0x464] ss:$16 sps:$4 sm:$0xff]  }
  0x71   :  { %1453 = vmatprep.subr.bf16.mxu0 %v4729_v45  ;;  %1494 = vmatprep.subr.bf16.mxu1 %v4732_v46  ;;  %v4789_v43 = vld [vmem:[#allocation2 + $0x460] ss:$16 sps:$4 sm:$0xff]   ;;  %v4797_v44 = vld [vmem:[#allocation2 + $0x484] ss:$16 sps:$4 sm:$0xff]   ;;  %v4794_v45 = vld [vmem:[#allocation2 + $0x4c] ss:$16 sps:$4 sm:$0xff]  }
  0x72   :  { %v4792_v46 = vld [vmem:[#allocation2 + $0x48] ss:$16 sps:$4 sm:$0xff]   ;;  %v4795_v47 = vld [vmem:[#allocation2 + $0x480] ss:$16 sps:$4 sm:$0xff]   ;;  %v4809_v53 = vld [vmem:[#allocation2 + $0x4c4] ss:$16 sps:$4 sm:$0xff]  }
  0x73   :  { %v4815_v57 = vld [vmem:[#allocation2 + $0x4e4] ss:$16 sps:$4 sm:$0xff]   ;;  %v4813_v60 = vld [vmem:[#allocation2 + $0x4e0] ss:$16 sps:$4 sm:$0xff]  }
  0x74   :  { %1454 = vmatpush1.bf16.msra.mxu0 %v4727_v49  ;;  %1495 = vmatpush1.bf16.msra.mxu1 %v4730_v50  ;;  %v4803_v49 = vld [vmem:[#allocation2 + $0x4a4] ss:$16 sps:$4 sm:$0xff]   ;;  %v4800_v50 = vld [vmem:[#allocation2 + $0x6c] ss:$16 sps:$4 sm:$0xff]   ;;  %v4825_v5 = vld [vmem:[#allocation2 + $0x520] ss:$16 sps:$4 sm:$0xff]  }
  0x75   :  { %1455 = vmatprep.subr.bf16.mxu0 %v4735_v51  ;;  %1496 = vmatprep.subr.bf16.mxu1 %v4738_v52  ;;  %v4798_v51 = vld [vmem:[#allocation2 + $0x68] ss:$16 sps:$4 sm:$0xff]   ;;  %v4801_v52 = vld [vmem:[#allocation2 + $0x4a0] ss:$16 sps:$4 sm:$0xff]   ;;  %v4851_v19 = vld [vmem:[#allocation2 + $0x5a4] ss:$16 sps:$4 sm:$0xff]  }
  0x76   :  { %v4863_v30 = vld [vmem:[#allocation2 + $0x5e4] ss:$16 sps:$4 sm:$0xff]  }
  0x78   :  { %1456 = vmatpush1.bf16.msra.mxu0 %v4733_v54  ;;  %1497 = vmatpush1.bf16.msra.mxu1 %v4736_v55  ;;  %v4806_v54 = vld [vmem:[#allocation2 + $0x8c] ss:$16 sps:$4 sm:$0xff]   ;;  %v4804_v55 = vld [vmem:[#allocation2 + $0x88] ss:$16 sps:$4 sm:$0xff]  }
  0x79   :  { %1457 = vmatprep.subr.bf16.mxu0 %v4741_v56  ;;  %1498 = vmatprep.subr.bf16.mxu1 %v4744_v58  ;;  %v4807_v56 = vld [vmem:[#allocation2 + $0x4c0] ss:$16 sps:$4 sm:$0xff]   ;;  %v4812_v58 = vld [vmem:[#allocation2 + $0xac] ss:$16 sps:$4 sm:$0xff]  }
  0x7c   :  { %1458 = vmatpush1.bf16.msra.mxu0 %v4739_v61  ;;  %1499 = vmatpush1.bf16.msra.mxu1 %v4742_v1  ;;  %v4821_v61 = vld [vmem:[#allocation2 + $0x504] ss:$16 sps:$4 sm:$0xff]   ;;  %v4819_v1 = vld [vmem:[#allocation2 + $0x500] ss:$16 sps:$4 sm:$0xff]  }
  0x7d   :  { %1459 = vmatprep.subr.bf16.mxu0 %v4747_v2  ;;  %1500 = vmatprep.subr.bf16.mxu1 %v4750_v3  ;;  %v4827_v2 = vld [vmem:[#allocation2 + $0x524] ss:$16 sps:$4 sm:$0xff]   ;;  %v4824_v3 = vld [vmem:[#allocation2 + $0xec] ss:$16 sps:$4 sm:$0xff]  }
  0x80   :  { %1460 = vmatpush1.bf16.msra.mxu0 %v4745_v6  ;;  %1501 = vmatpush1.bf16.msra.mxu1 %v4748_v7  ;;  %v4833_v6 = vld [vmem:[#allocation2 + $0x544] ss:$16 sps:$4 sm:$0xff]   ;;  %v4830_v7 = vld [vmem:[#allocation2 + $0x10c] ss:$16 sps:$4 sm:$0xff]  }
  0x81   :  { %1461 = vmatprep.subr.bf16.mxu0 %v4753_v9  ;;  %1502 = vmatprep.subr.bf16.mxu1 %v4756_v10  ;;  %v4828_v9 = vld [vmem:[#allocation2 + $0x108] ss:$16 sps:$4 sm:$0xff]   ;;  %v4831_v10 = vld [vmem:[#allocation2 + $0x540] ss:$16 sps:$4 sm:$0xff]  }
  0x84   :  { %1462 = vmatpush1.bf16.msra.mxu0 %v4751_v11  ;;  %1503 = vmatpush1.bf16.msra.mxu1 %v4754_v12  ;;  %v4839_v11 = vld [vmem:[#allocation2 + $0x564] ss:$16 sps:$4 sm:$0xff]   ;;  %v4836_v12 = vld [vmem:[#allocation2 + $0x12c] ss:$16 sps:$4 sm:$0xff]  }
  0x85   :  { %1463 = vmatprep.subr.bf16.mxu0 %v4759_v13  ;;  %1504 = vmatprep.subr.bf16.mxu1 %v4762_v14  ;;  %v4834_v13 = vld [vmem:[#allocation2 + $0x128] ss:$16 sps:$4 sm:$0xff]   ;;  %v4837_v14 = vld [vmem:[#allocation2 + $0x560] ss:$16 sps:$4 sm:$0xff]  }
  0x88   :  { %1464 = vmatpush1.bf16.msra.mxu0 %v4757_v15  ;;  %1505 = vmatpush1.bf16.msra.mxu1 %v4760_v16  ;;  %v4845_v15 = vld [vmem:[#allocation2 + $0x584] ss:$16 sps:$4 sm:$0xff]   ;;  %v4842_v16 = vld [vmem:[#allocation2 + $0x14c] ss:$16 sps:$4 sm:$0xff]  }
  0x89   :  { %1465 = vmatprep.subr.bf16.mxu0 %v4765_v17  ;;  %1506 = vmatprep.subr.bf16.mxu1 %v4768_v18  ;;  %v4840_v17 = vld [vmem:[#allocation2 + $0x148] ss:$16 sps:$4 sm:$0xff]   ;;  %v4843_v18 = vld [vmem:[#allocation2 + $0x580] ss:$16 sps:$4 sm:$0xff]  }
  0x8c   :  { %1466 = vmatpush1.bf16.msra.mxu0 %v4763_v21  ;;  %1507 = vmatpush1.bf16.msra.mxu1 %v4766_v22  ;;  %v4848_v21 = vld [vmem:[#allocation2 + $0x16c] ss:$16 sps:$4 sm:$0xff]   ;;  %v4846_v22 = vld [vmem:[#allocation2 + $0x168] ss:$16 sps:$4 sm:$0xff]  }
  0x8d   :  { %1517 = vmatprep.subr.bf16.mxu0 %v4772_v23  ;;  %1558 = vmatprep.subr.bf16.mxu1 %v4775_v24  ;;  %v4849_v23 = vld [vmem:[#allocation2 + $0x5a0] ss:$16 sps:$4 sm:$0xff]   ;;  %v4857_v24 = vld [vmem:[#allocation2 + $0x5c4] ss:$16 sps:$4 sm:$0xff]  }
  0x8f   :  { %1468 = vmatmul.mubr.bf16.vlgmr.msra.gmra.mrb[4].mxu0 %v5661_v25  ;;  %1509 = vmatmul.mubr.bf16.vlgmr.msra.gmra.mrb[4].mxu1 %v5665_v27 }
  0x90   :  { %1518 = vmatpush1.bf16.msra.mxu0 %v4770_v28  ;;  %1559 = vmatpush1.bf16.msra.mxu1 %v4773_v29  ;;  %v4852_v28 = vld [vmem:[#allocation2 + $0x188] ss:$16 sps:$4 sm:$0xff]   ;;  %v4855_v29 = vld [vmem:[#allocation2 + $0x5c0] ss:$16 sps:$4 sm:$0xff]  }
  0x91   :  { %1519 = vmatprep.subr.bf16.mxu0 %v4778_v31  ;;  %1590 = vmatprep.mubr.bf16.mxu1 %v5487_v0  ;;  %v4860_v31 = vld [vmem:[#allocation2 + $0x1ac] ss:$16 sps:$4 sm:$0xff]  }
  0x92   :  { %1599 = vmatprep.subr.bf16.mxu1 %v4781_v32  ;;  %1549 = vmatprep.mubr.bf16.mxu0 %v5668_v33  ;;  %v4858_v32 = vld [vmem:[#allocation2 + $0x1a8] ss:$16 sps:$4 sm:$0xff]  }
  0x94   :  { %1520 = vmatpush1.bf16.msra.mxu0 %v4776_v34  ;;  %v4861_v34 = vld [vmem:[#allocation2 + $0x5e0] ss:$16 sps:$4 sm:$0xff]  }
  0x95   :  { %1521 = vmatprep.subr.bf16.mxu0 %v4784_v36  ;;  %v4866_v36 = vld [vmem:[#allocation2 + $0x1cc] ss:$16 sps:$4 sm:$0xff]  }
  0x97   :  { %4298 = vmatmul.mubr.msk.bf16.vlgmr.msra.gmra.mrb[8].mxu1 %vm366_vm0, %v5674_v39 }
  0x98   :  { %1522 = vmatpush1.bf16.msra.mxu0 %v4782_v38  ;;  %1600 = vmatpush1.bf16.msra.mxu1 %v4779_v37  ;;  %v4864_v37 = vld [vmem:[#allocation2 + $0x1c8] ss:$16 sps:$4 sm:$0xff]   ;;  %v5681_v38 = vpack.c.bf16 %v5659_v20, %v5659_v20 }
  0x99   :  { %1523 = vmatprep.subr.bf16.mxu0 %v4791_v40  ;;  %1601 = vmatprep.subr.bf16.mxu1 %v4788_v41  ;;  %v4867_v40 = vld [vmem:[#allocation2 + $0x208] ss:$16 sps:$4 sm:$0xff]   ;;  %v4872_v41 = vld [vmem:[#allocation2 + $0x1ec] ss:$16 sps:$4 sm:$0xff]  }
  0x9a   :  { %1631 = vmatprep.mubr.bf16.mxu1 %v5649_v4  ;;  %v4822_v4 = vld [vmem:[#allocation2 + $0xe8] ss:$16 sps:$4 sm:$0xff]  }
  0x9b   :  { %v4879_v20 = vld [vmem:[#allocation2 + $0x248] ss:$16 sps:$4 sm:$0xff]  }
  0x9c   :  { %1524 = vmatpush1.bf16.msra.mxu0 %v4789_v43  ;;  %1602 = vmatpush1.bf16.msra.mxu1 %v4786_v42  ;;  %v4875_v42 = vld [vmem:[#allocation2 + $0x22c] ss:$16 sps:$4 sm:$0xff]   ;;  %v4873_v43 = vld [vmem:[#allocation2 + $0x228] ss:$16 sps:$4 sm:$0xff]  }
  0x9d   :  { %1525 = vmatprep.subr.bf16.mxu0 %v4797_v44  ;;  %1603 = vmatprep.subr.bf16.mxu1 %v4794_v45  ;;  %v4870_v44 = vld [vmem:[#allocation2 + $0x1e8] ss:$16 sps:$4 sm:$0xff]   ;;  %v4881_v45 = vld [vmem:[#allocation2 + $0x24c] ss:$16 sps:$4 sm:$0xff]  }
  0xa0   :  { %1526 = vmatpush1.bf16.msra.mxu0 %v4795_v47  ;;  %1604 = vmatpush1.bf16.msra.mxu1 %v4792_v46  ;;  %v4878_v46 = vld [vmem:[#allocation2 + $0x40c] ss:$16 sps:$4 sm:$0xff]   ;;  %v4876_v47 = vld [vmem:[#allocation2 + $0x408] ss:$16 sps:$4 sm:$0xff]  }
  0xa1   :  { %1527 = vmatprep.subr.bf16.mxu0 %v4803_v49  ;;  %1605 = vmatprep.subr.bf16.mxu1 %v4800_v50  ;;  %v4887_v49 = vld [vmem:[#allocation2 + $0x26c] ss:$16 sps:$4 sm:$0xff]  }
  0xa2   :  { %v4884_v50 = vld [vmem:[#allocation2 + $0x42c] ss:$16 sps:$4 sm:$0xff]  }
  0xa4   :  { %1528 = vmatpush1.bf16.msra.mxu0 %v4801_v52  ;;  %1606 = vmatpush1.bf16.msra.mxu1 %v4798_v51  ;;  %v4885_v51 = vld [vmem:[#allocation2 + $0x268] ss:$16 sps:$4 sm:$0xff]  }
  0xa5   :  { %1529 = vmatprep.subr.bf16.mxu0 %v4809_v53  ;;  %1607 = vmatprep.subr.bf16.mxu1 %v4806_v54  ;;  %v4882_v52 = vld [vmem:[#allocation2 + $0x428] ss:$16 sps:$4 sm:$0xff]   ;;  %v4893_v53 = vld [vmem:[#allocation2 + $0x28c] ss:$16 sps:$4 sm:$0xff]  }
  0xa6   :  { %v4890_v54 = vld [vmem:[#allocation2 + $0x44c] ss:$16 sps:$4 sm:$0xff]  }
  0xa8   :  { %1530 = vmatpush1.bf16.msra.mxu0 %v4807_v56  ;;  %1608 = vmatpush1.bf16.msra.mxu1 %v4804_v55  ;;  %v4888_v55 = vld [vmem:[#allocation2 + $0x448] ss:$16 sps:$4 sm:$0xff]   ;;  %v4899_v56 = vld [vmem:[#allocation2 + $0x2ac] ss:$16 sps:$4 sm:$0xff]  }
  0xa9   :  { %1531 = vmatprep.subr.bf16.mxu0 %v4815_v57  ;;  %1609 = vmatprep.subr.bf16.mxu1 %v4812_v58  ;;  %v4896_v57 = vld [vmem:[#allocation2 + $0x46c] ss:$16 sps:$4 sm:$0xff]   ;;  %v4897_v58 = vld [vmem:[#allocation2 + $0x2a8] ss:$16 sps:$4 sm:$0xff]  }
  0xac   :  { %1532 = vmatpush1.bf16.msra.mxu0 %v4813_v60  ;;  %1610 = vmatpush1.bf16.msra.mxu1 %v4810_v59  ;;  %v4894_v59 = vld [vmem:[#allocation2 + $0x468] ss:$16 sps:$4 sm:$0xff]   ;;  %v4905_v60 = vld [vmem:[#allocation2 + $0x2cc] ss:$16 sps:$4 sm:$0xff]  }
  0xad   :  { %1533 = vmatprep.subr.bf16.mxu0 %v4821_v61  ;;  %1611 = vmatprep.subr.bf16.mxu1 %v4818_v62  ;;  %v4903_v61 = vld [vmem:[#allocation2 + $0x2c8] ss:$16 sps:$4 sm:$0xff]  }
  0xae   :  { %v4900_v62 = vld [vmem:[#allocation2 + $0x488] ss:$16 sps:$4 sm:$0xff]  }
  0xb0   :  { %1534 = vmatpush1.bf16.msra.mxu0 %v4819_v1  ;;  %1612 = vmatpush1.bf16.msra.mxu1 %v4816_v63  ;;  %v4911_v63 = vld [vmem:[#allocation2 + $0x2ec] ss:$16 sps:$4 sm:$0xff]   ;;  %v4909_v1 = vld [vmem:[#allocation2 + $0x2e8] ss:$16 sps:$4 sm:$0xff]  }
  0xb1   :  { %1535 = vmatprep.subr.bf16.mxu0 %v4827_v2  ;;  %1613 = vmatprep.subr.bf16.mxu1 %v4824_v3  ;;  %v4906_v2 = vld [vmem:[#allocation2 + $0x4a8] ss:$16 sps:$4 sm:$0xff]   ;;  %v4917_v3 = vld [vmem:[#allocation2 + $0x30c] ss:$16 sps:$4 sm:$0xff]  }
  0xb4   :  { %1536 = vmatpush1.bf16.msra.mxu0 %v4825_v5  ;;  %1614 = vmatpush1.bf16.msra.mxu1 %v4822_v4  ;;  %v4914_v4 = vld [vmem:[#allocation2 + $0x4cc] ss:$16 sps:$4 sm:$0xff]   ;;  %v4915_v5 = vld [vmem:[#allocation2 + $0x308] ss:$16 sps:$4 sm:$0xff]  }
  0xb5   :  { %1537 = vmatprep.subr.bf16.mxu0 %v4833_v6  ;;  %1615 = vmatprep.subr.bf16.mxu1 %v4830_v7  ;;  %v4912_v6 = vld [vmem:[#allocation2 + $0x4c8] ss:$16 sps:$4 sm:$0xff]   ;;  %v4923_v7 = vld [vmem:[#allocation2 + $0x32c] ss:$16 sps:$4 sm:$0xff]  }
  0xb8   :  { %1538 = vmatpush1.bf16.msra.mxu0 %v4831_v10  ;;  %1616 = vmatpush1.bf16.msra.mxu1 %v4828_v9  ;;  %v4920_v9 = vld [vmem:[#allocation2 + $0x4ec] ss:$16 sps:$4 sm:$0xff]   ;;  %v4921_v10 = vld [vmem:[#allocation2 + $0x328] ss:$16 sps:$4 sm:$0xff]  }
  0xb9   :  { %1539 = vmatprep.subr.bf16.mxu0 %v4839_v11  ;;  %1617 = vmatprep.subr.bf16.mxu1 %v4836_v12  ;;  %v4918_v11 = vld [vmem:[#allocation2 + $0x4e8] ss:$16 sps:$4 sm:$0xff]   ;;  %v4929_v12 = vld [vmem:[#allocation2 + $0x34c] ss:$16 sps:$4 sm:$0xff]  }
  0xbc   :  { %1540 = vmatpush1.bf16.msra.mxu0 %v4837_v14  ;;  %1618 = vmatpush1.bf16.msra.mxu1 %v4834_v13  ;;  %v4926_v13 = vld [vmem:[#allocation2 + $0x50c] ss:$16 sps:$4 sm:$0xff]   ;;  %v4927_v14 = vld [vmem:[#allocation2 + $0x348] ss:$16 sps:$4 sm:$0xff]  }
  0xbd   :  { %1541 = vmatprep.subr.bf16.mxu0 %v4845_v15  ;;  %1619 = vmatprep.subr.bf16.mxu1 %v4842_v16  ;;  %v4924_v15 = vld [vmem:[#allocation2 + $0x508] ss:$16 sps:$4 sm:$0xff]   ;;  %v4935_v16 = vld [vmem:[#allocation2 + $0x36c] ss:$16 sps:$4 sm:$0xff]  }
  0xc0   :  { %1542 = vmatpush1.bf16.msra.mxu0 %v4843_v18  ;;  %1620 = vmatpush1.bf16.msra.mxu1 %v4840_v17  ;;  %v4932_v17 = vld [vmem:[#allocation2 + $0x52c] ss:$16 sps:$4 sm:$0xff]   ;;  %v4933_v18 = vld [vmem:[#allocation2 + $0x368] ss:$16 sps:$4 sm:$0xff]  }
  0xc1   :  { %1543 = vmatprep.subr.bf16.mxu0 %v4851_v19  ;;  %1621 = vmatprep.subr.bf16.mxu1 %v4848_v21  ;;  %v4930_v19 = vld [vmem:[#allocation2 + $0x528] ss:$16 sps:$4 sm:$0xff]   ;;  %v4941_v21 = vld [vmem:[#allocation2 + $0x38c] ss:$16 sps:$4 sm:$0xff]  }
  0xc4   :  { %1544 = vmatpush1.bf16.msra.mxu0 %v4849_v23  ;;  %1622 = vmatpush1.bf16.msra.mxu1 %v4846_v22  ;;  %v4938_v22 = vld [vmem:[#allocation2 + $0x54c] ss:$16 sps:$4 sm:$0xff]   ;;  %v4939_v23 = vld [vmem:[#allocation2 + $0x388] ss:$16 sps:$4 sm:$0xff]  }
  0xc5   :  { %1545 = vmatprep.subr.bf16.mxu0 %v4857_v24  ;;  %1623 = vmatprep.subr.bf16.mxu1 %v4854_v26  ;;  %v4936_v24 = vld [vmem:[#allocation2 + $0x548] ss:$16 sps:$4 sm:$0xff]   ;;  %v4947_v26 = vld [vmem:[#allocation2 + $0x3ac] ss:$16 sps:$4 sm:$0xff]  }
  0xc8   :  { %1546 = vmatpush1.bf16.msra.mxu0 %v4855_v29  ;;  %1624 = vmatpush1.bf16.msra.mxu1 %v4852_v28  ;;  %v4944_v28 = vld [vmem:[#allocation2 + $0x56c] ss:$16 sps:$4 sm:$0xff]   ;;  %v4945_v29 = vld [vmem:[#allocation2 + $0x3a8] ss:$16 sps:$4 sm:$0xff]  }
  0xc9   :  { %1547 = vmatprep.subr.bf16.mxu0 %v4863_v30  ;;  %1625 = vmatprep.subr.bf16.mxu1 %v4860_v31  ;;  %v4942_v30 = vld [vmem:[#allocation2 + $0x568] ss:$16 sps:$4 sm:$0xff]   ;;  %v4953_v31 = vld [vmem:[#allocation2 + $0x3cc] ss:$16 sps:$4 sm:$0xff]  }
  0xcc   :  { %1548 = vmatpush1.bf16.msra.mxu0 %v4861_v34  ;;  %1626 = vmatpush1.bf16.msra.mxu1 %v4858_v32  ;;  %v4950_v32 = vld [vmem:[#allocation2 + $0x58c] ss:$16 sps:$4 sm:$0xff]   ;;  %v4951_v34 = vld [vmem:[#allocation2 + $0x3c8] ss:$16 sps:$4 sm:$0xff]  }
  0xcd   :  { %1640 = vmatprep.subr.bf16.mxu0 %v4869_v35  ;;  %1627 = vmatprep.subr.bf16.mxu1 %v4866_v36  ;;  %v4948_v35 = vld [vmem:[#allocation2 + $0x588] ss:$16 sps:$4 sm:$0xff]   ;;  %v4959_v36 = vld [vmem:[#allocation2 + $0x3ec] ss:$16 sps:$4 sm:$0xff]  }
  0xcf   :  { %1550 = vmatmul.mubr.bf16.vlgmr.msra.gmra.mrb[8].mxu0 %v5681_v38 }
  0xd0   :  { %1641 = vmatpush1.bf16.msra.mxu0 %v4867_v40  ;;  %1672 = vmatprep.mubr.bf16.mxu0 %v5652_v8  ;;  %v4891_v8 = vld [vmem:[#allocation2 + $0x288] ss:$16 sps:$4 sm:$0xff]  }
  0xd1   :  { %1628 = vmatpush1.bf16.msra.mxu1 %v4864_v37  ;;  %1642 = vmatprep.subr.bf16.mxu0 %v4875_v42  ;;  %v4956_v37 = vld [vmem:[#allocation2 + $0x5ac] ss:$16 sps:$4 sm:$0xff]   ;;  %v4957_v40 = vld [vmem:[#allocation2 + $0x3e8] ss:$16 sps:$4 sm:$0xff]  }
  0xd2   :  { %1629 = vmatprep.subr.bf16.mxu1 %v4872_v41  ;;  %v4954_v41 = vld [vmem:[#allocation2 + $0x5a8] ss:$16 sps:$4 sm:$0xff]   ;;  %v4965_v42 = vld [vmem:[#allocation2 + $0x60c] ss:$16 sps:$4 sm:$0xff]  }
  0xd4   :  { %1643 = vmatpush1.bf16.msra.mxu0 %v4873_v43  ;;  %v4962_v43 = vld [vmem:[#allocation2 + $0x5cc] ss:$16 sps:$4 sm:$0xff]  }
  0xd5   :  { %1630 = vmatpush1.bf16.msra.mxu1 %v4870_v44  ;;  %1644 = vmatprep.subr.bf16.mxu0 %v4881_v45  ;;  %v4963_v44 = vld [vmem:[#allocation2 + $0x608] ss:$16 sps:$4 sm:$0xff]  }
  0xd6   :  { %1681 = vmatprep.subr.bf16.mxu1 %v4878_v46  ;;  %v4960_v45 = vld [vmem:[#allocation2 + $0x5c8] ss:$16 sps:$4 sm:$0xff]   ;;  %v4971_v46 = vld [vmem:[#allocation4 + $0x4] ss:$16 sps:$4 sm:$0xff]  }
  0xd8   :  { %1632 = vmatmul.mubr.bf16.vlgmr.msra.gmra.mrb[12].mxu1 %v5661_v25  ;;  %1645 = vmatpush1.bf16.msra.mxu0 %v4879_v20  ;;  %v4902_v25 = vld [vmem:[#allocation2 + $0x48c] ss:$16 sps:$4 sm:$0xff]  }
  0xd9   :  { %1682 = vmatpush1.bf16.msra.mxu1 %v4876_v47  ;;  %1646 = vmatprep.subr.bf16.mxu0 %v4887_v49  ;;  %v4968_v20 = vld [vmem:[#allocation2 + $0x5ec] ss:$16 sps:$4 sm:$0xff]   ;;  %v4966_v47 = vld [vmem:[#allocation2 + $0x5e8] ss:$16 sps:$4 sm:$0xff]  }
  0xda   :  { %1683 = vmatprep.subr.bf16.mxu1 %v4884_v50  ;;  %1713 = vmatprep.mubr.bf16.mxu1 %v5668_v33  ;;  %v4908_v33 = vld [vmem:[#allocation2 + $0x4ac] ss:$16 sps:$4 sm:$0xff]   ;;  %v4969_v50 = vld [vmem:[#allocation4] ss:$16 sps:$4 sm:$0xff]  }
  0xdb   :  { %v4974_v49 = vld [vmem:[#allocation4 + $0xc] ss:$16 sps:$4 sm:$0xff]  }
  0xdc   :  { %1647 = vmatpush1.bf16.msra.mxu0 %v4885_v51  ;;  %v4972_v51 = vld [vmem:[#allocation4 + $0x8] ss:$16 sps:$4 sm:$0xff]  }
  0xdd   :  { %1684 = vmatpush1.bf16.msra.mxu1 %v4882_v52  ;;  %1648 = vmatprep.subr.bf16.mxu0 %v4893_v53  ;;  %v4977_v52 = vld [vmem:[#allocation4 + $0x24] ss:$16 sps:$4 sm:$0xff]   ;;  %v4980_v53 = vld [vmem:[#allocation4 + $0x2c] ss:$16 sps:$4 sm:$0xff]  }
  0xde   :  { %1685 = vmatprep.subr.bf16.mxu1 %v4890_v54  ;;  %v4975_v54 = vld [vmem:[#allocation4 + $0x20] ss:$16 sps:$4 sm:$0xff]  }
  0xe0   :  { %1649 = vmatpush1.bf16.msra.mxu0 %v4891_v8  ;;  %v4978_v8 = vld [vmem:[#allocation4 + $0x28] ss:$16 sps:$4 sm:$0xff]  }
  0xe1   :  { %1686 = vmatpush1.bf16.msra.mxu1 %v4888_v55  ;;  %1650 = vmatprep.subr.bf16.mxu0 %v4899_v56  ;;  %v4981_v55 = vld [vmem:[#allocation4 + $0x40] ss:$16 sps:$4 sm:$0xff]   ;;  %v4984_v56 = vld [vmem:[#allocation4 + $0x48] ss:$16 sps:$4 sm:$0xff]  }
  0xe2   :  { %1687 = vmatprep.subr.bf16.mxu1 %v4896_v57  ;;  %v4989_v57 = vld [vmem:[#allocation4 + $0x64] ss:$16 sps:$4 sm:$0xff]  }
  0xe4   :  { %1651 = vmatpush1.bf16.msra.mxu0 %v4897_v58  ;;  %v4992_v58 = vld [vmem:[#allocation4 + $0x6c] ss:$16 sps:$4 sm:$0xff]  }
  0xe5   :  { %1688 = vmatpush1.bf16.msra.mxu1 %v4894_v59  ;;  %1652 = vmatprep.subr.bf16.mxu0 %v4905_v60  ;;  %v4987_v59 = vld [vmem:[#allocation4 + $0x60] ss:$16 sps:$4 sm:$0xff]   ;;  %v4990_v60 = vld [vmem:[#allocation4 + $0x68] ss:$16 sps:$4 sm:$0xff]  }
  0xe6   :  { %1689 = vmatprep.subr.bf16.mxu1 %v4902_v25  ;;  %v4998_v25 = vld [vmem:[#allocation4 + $0x8c] ss:$16 sps:$4 sm:$0xff]  }
  0xe8   :  { %1653 = vmatpush1.bf16.msra.mxu0 %v4903_v61 }
  0xe9   :  { %1690 = vmatpush1.bf16.msra.mxu1 %v4900_v62  ;;  %1654 = vmatprep.subr.bf16.mxu0 %v4911_v63 }
  0xea   :  { %1691 = vmatprep.subr.bf16.mxu1 %v4908_v33 }
  0xec   :  { %1655 = vmatpush1.bf16.msra.mxu0 %v4909_v1 }
  0xed   :  { %1692 = vmatpush1.bf16.msra.mxu1 %v4906_v2  ;;  %1656 = vmatprep.subr.bf16.mxu0 %v4917_v3  ;;  %v4993_v2 = vld [vmem:[#allocation4 + $0x80] ss:$16 sps:$4 sm:$0xff]   ;;  %v4996_v3 = vld [vmem:[#allocation4 + $0x88] ss:$16 sps:$4 sm:$0xff]  }
  0xee   :  { %1693 = vmatprep.subr.bf16.mxu1 %v4914_v4 }
  0xf0   :  { %1657 = vmatpush1.bf16.msra.mxu0 %v4915_v5 }
  0xf1   :  { %1694 = vmatpush1.bf16.msra.mxu1 %v4912_v6  ;;  %1658 = vmatprep.subr.bf16.mxu0 %v4923_v7  ;;  %v5001_v6 = vld [vmem:[#allocation4 + $0xa4] ss:$16 sps:$4 sm:$0xff]   ;;  %v5004_v7 = vld [vmem:[#allocation4 + $0xac] ss:$16 sps:$4 sm:$0xff]  }
  0xf2   :  { %1695 = vmatprep.subr.bf16.mxu1 %v4920_v9  ;;  %v4999_v9 = vld [vmem:[#allocation4 + $0xa0] ss:$16 sps:$4 sm:$0xff]  }
  0xf4   :  { %1659 = vmatpush1.bf16.msra.mxu0 %v4921_v10  ;;  %v5002_v10 = vld [vmem:[#allocation4 + $0xa8] ss:$16 sps:$4 sm:$0xff]  }
  0xf5   :  { %1696 = vmatpush1.bf16.msra.mxu1 %v4918_v11  ;;  %1660 = vmatprep.subr.bf16.mxu0 %v4929_v12  ;;  %v5007_v11 = vld [vmem:[#allocation4 + $0xc4] ss:$16 sps:$4 sm:$0xff]   ;;  %v5010_v12 = vld [vmem:[#allocation4 + $0xcc] ss:$16 sps:$4 sm:$0xff]  }
  0xf6   :  { %1697 = vmatprep.subr.bf16.mxu1 %v4926_v13  ;;  %v5005_v13 = vld [vmem:[#allocation4 + $0xc0] ss:$16 sps:$4 sm:$0xff]  }
  0xf8   :  { %1661 = vmatpush1.bf16.msra.mxu0 %v4927_v14  ;;  %v5008_v14 = vld [vmem:[#allocation4 + $0xc8] ss:$16 sps:$4 sm:$0xff]  }
  0xf9   :  { %1698 = vmatpush1.bf16.msra.mxu1 %v4924_v15  ;;  %1662 = vmatprep.subr.bf16.mxu0 %v4935_v16  ;;  %v5013_v15 = vld [vmem:[#allocation4 + $0xe4] ss:$16 sps:$4 sm:$0xff]   ;;  %v5016_v16 = vld [vmem:[#allocation4 + $0xec] ss:$16 sps:$4 sm:$0xff]  }
  0xfa   :  { %1699 = vmatprep.subr.bf16.mxu1 %v4932_v17  ;;  %v5011_v17 = vld [vmem:[#allocation4 + $0xe0] ss:$16 sps:$4 sm:$0xff]  }
  0xfc   :  { %1663 = vmatpush1.bf16.msra.mxu0 %v4933_v18  ;;  %v5014_v18 = vld [vmem:[#allocation4 + $0xe8] ss:$16 sps:$4 sm:$0xff]  }
  0xfd   :  { %1700 = vmatpush1.bf16.msra.mxu1 %v4930_v19  ;;  %1664 = vmatprep.subr.bf16.mxu0 %v4941_v21  ;;  %v5019_v19 = vld [vmem:[#allocation4 + $0x104] ss:$16 sps:$4 sm:$0xff]   ;;  %v5017_v21 = vld [vmem:[#allocation4 + $0x100] ss:$16 sps:$4 sm:$0xff]  }
  0xfe   :  { %1701 = vmatprep.subr.bf16.mxu1 %v4938_v22  ;;  %v5022_v22 = vld [vmem:[#allocation4 + $0x10c] ss:$16 sps:$4 sm:$0xff]  }
 0x100   :  { %1665 = vmatpush1.bf16.msra.mxu0 %v4939_v23  ;;  %v5020_v23 = vld [vmem:[#allocation4 + $0x108] ss:$16 sps:$4 sm:$0xff]  }
 0x101   :  { %1702 = vmatpush1.bf16.msra.mxu1 %v4936_v24  ;;  %1666 = vmatprep.subr.bf16.mxu0 %v4947_v26  ;;  %v5025_v24 = vld [vmem:[#allocation4 + $0x124] ss:$16 sps:$4 sm:$0xff]   ;;  %v5023_v26 = vld [vmem:[#allocation4 + $0x120] ss:$16 sps:$4 sm:$0xff]  }
 0x102   :  { %1703 = vmatprep.subr.bf16.mxu1 %v4944_v28  ;;  %v5028_v28 = vld [vmem:[#allocation4 + $0x12c] ss:$16 sps:$4 sm:$0xff]  }
 0x104   :  { %1667 = vmatpush1.bf16.msra.mxu0 %v4945_v29  ;;  %v5026_v29 = vld [vmem:[#allocation4 + $0x128] ss:$16 sps:$4 sm:$0xff]  }
 0x105   :  { %1704 = vmatpush1.bf16.msra.mxu1 %v4942_v30  ;;  %1668 = vmatprep.subr.bf16.mxu0 %v4953_v31  ;;  %v5031_v30 = vld [vmem:[#allocation4 + $0x144] ss:$16 sps:$4 sm:$0xff]   ;;  %v5029_v31 = vld [vmem:[#allocation4 + $0x140] ss:$16 sps:$4 sm:$0xff]  }
 0x106   :  { %1705 = vmatprep.subr.bf16.mxu1 %v4950_v32  ;;  %v5034_v32 = vld [vmem:[#allocation4 + $0x14c] ss:$16 sps:$4 sm:$0xff]  }
 0x108   :  { %1669 = vmatpush1.bf16.msra.mxu0 %v4951_v34  ;;  %v5032_v34 = vld [vmem:[#allocation4 + $0x148] ss:$16 sps:$4 sm:$0xff]  }
 0x109   :  { %1706 = vmatpush1.bf16.msra.mxu1 %v4948_v35  ;;  %1670 = vmatprep.subr.bf16.mxu0 %v4959_v36  ;;  %v5037_v35 = vld [vmem:[#allocation4 + $0x164] ss:$16 sps:$4 sm:$0xff]   ;;  %v5035_v36 = vld [vmem:[#allocation4 + $0x160] ss:$16 sps:$4 sm:$0xff]  }
 0x10a   :  { %1707 = vmatprep.subr.bf16.mxu1 %v4956_v37  ;;  %v5040_v37 = vld [vmem:[#allocation4 + $0x16c] ss:$16 sps:$4 sm:$0xff]  }
 0x10c   :  { %1671 = vmatpush1.bf16.msra.mxu0 %v4957_v40  ;;  %v5038_v40 = vld [vmem:[#allocation4 + $0x168] ss:$16 sps:$4 sm:$0xff]  }
 0x10d   :  { %1708 = vmatpush1.bf16.msra.mxu1 %v4954_v41  ;;  %1722 = vmatprep.subr.bf16.mxu0 %v4965_v42  ;;  %v5043_v41 = vld [vmem:[#allocation4 + $0x184] ss:$16 sps:$4 sm:$0xff]   ;;  %v5041_v42 = vld [vmem:[#allocation4 + $0x180] ss:$16 sps:$4 sm:$0xff]  }
 0x10e   :  { %1709 = vmatprep.subr.bf16.mxu1 %v4962_v43  ;;  %v5046_v43 = vld [vmem:[#allocation4 + $0x18c] ss:$16 sps:$4 sm:$0xff]  }
 0x10f   :  { %1673 = vmatmul.mubr.bf16.vlgmr.msra.gmra.mrb[12].mxu0 %v5665_v27  ;;  %v4983_v27 = vld [vmem:[#allocation4 + $0x44] ss:$16 sps:$4 sm:$0xff]  }
 0x110   :  { %1723 = vmatpush1.bf16.msra.mxu0 %v4963_v44  ;;  %1754 = vmatprep.mubr.bf16.mxu0 %v5487_v0  ;;  %v4986_v0 = vld [vmem:[#allocation4 + $0x4c] ss:$16 sps:$4 sm:$0xff]   ;;  %v5044_v44 = vld [vmem:[#allocation4 + $0x188] ss:$16 sps:$4 sm:$0xff]  }
 0x111   :  { %1710 = vmatpush1.bf16.msra.mxu1 %v4960_v45  ;;  %2595 = vmatprep.subr.bf16.mxu0 %v4971_v46  ;;  %v5049_v45 = vld [vmem:[#allocation4 + $0x1a4] ss:$16 sps:$4 sm:$0xff]   ;;  %v5047_v46 = vld [vmem:[#allocation4 + $0x1a0] ss:$16 sps:$4 sm:$0xff]  }
 0x112   :  { %1711 = vmatprep.subr.bf16.mxu1 %v4968_v20  ;;  %v5052_v20 = vld [vmem:[#allocation4 + $0x1ac] ss:$16 sps:$4 sm:$0xff]  }
 0x115   :  { %1712 = vmatpush1.bf16.msra.mxu1 %v4966_v47  ;;  %v5050_v47 = vld [vmem:[#allocation4 + $0x1a8] ss:$16 sps:$4 sm:$0xff]  }
 0x116   :  { %2677 = vmatprep.subr.bf16.mxu1 %v4974_v49  ;;  %v5055_v49 = vld [vmem:[#allocation4 + $0x1c4] ss:$16 sps:$4 sm:$0xff]  }
 0x117   :  { %4299 = vmatmul.mubr.msk.bf16.vlgmr.msra.gmra.mrb[16].mxu0 %vm366_vm0, %v5674_v39  ;;  %v4995_v39 = vld [vmem:[#allocation4 + $0x84] ss:$16 sps:$4 sm:$0xff]  }
 0x118   :  { %1714 = vmatmul.mubr.bf16.vlgmr.msra.gmra.mrb[16].mxu1 %v5681_v38  ;;  %2596 = vmatpush1.bf16.msra.mxu0 %v4969_v50  ;;  %v5053_v50 = vld [vmem:[#allocation4 + $0x1c0] ss:$16 sps:$4 sm:$0xff]  }
 0x119   :  { %2678 = vmatpush1.bf16.msra.mxu1 %v4972_v51  ;;  %2597 = vmatprep.subr.bf16.mxu0 %v4977_v52  ;;  %v5058_v51 = vld [vmem:[#allocation4 + $0x1cc] ss:$16 sps:$4 sm:$0xff]   ;;  %v5056_v52 = vld [vmem:[#allocation4 + $0x1c8] ss:$16 sps:$4 sm:$0xff]  }
 0x11a   :  { %2679 = vmatprep.subr.bf16.mxu1 %v4980_v53  ;;  %v5061_v53 = vld [vmem:[#allocation4 + $0x1e4] ss:$16 sps:$4 sm:$0xff]  }
 0x11c   :  { %2598 = vmatpush1.bf16.msra.mxu0 %v4975_v54  ;;  %v5059_v54 = vld [vmem:[#allocation4 + $0x1e0] ss:$16 sps:$4 sm:$0xff]  }
 0x11d   :  { %2680 = vmatpush1.bf16.msra.mxu1 %v4978_v8  ;;  %2599 = vmatprep.subr.bf16.mxu0 %v4983_v27  ;;  %v5064_v8 = vld [vmem:[#allocation4 + $0x1ec] ss:$16 sps:$4 sm:$0xff]   ;;  %v5062_v27 = vld [vmem:[#allocation4 + $0x1e8] ss:$16 sps:$4 sm:$0xff]  }
 0x11e   :  { %2681 = vmatprep.subr.bf16.mxu1 %v4986_v0  ;;  %v5067_v0 = vld [vmem:[#allocation4 + $0x204] ss:$16 sps:$4 sm:$0xff]  }
 0x120   :  { %2600 = vmatpush1.bf16.msra.mxu0 %v4981_v55  ;;  %v5070_v55 = vld [vmem:[#allocation4 + $0x20c] ss:$16 sps:$4 sm:$0xff]  }
 0x121   :  { %2682 = vmatpush1.bf16.msra.mxu1 %v4984_v56  ;;  %2601 = vmatprep.subr.bf16.mxu0 %v4989_v57 }
 0x122   :  { %v5692_v38 = vpop.f32.mrb[0].mxu0  ;;  %v5694_v61 = vpop.f32.mrb[0].mxu1  ;;  %2683 = vmatprep.subr.bf16.mxu1 %v4992_v58 }
 0x123   :  { %v5696_v62 = vpop.f32.mrb[1].mxu0  ;;  %v5698_v63 = vpop.f32.mrb[1].mxu1 }
 0x124   :  { %v408_v33 = vpop.f32.mrb[2].mxu0  ;;  %v449_v1 = vpop.f32.mrb[2].mxu1  ;;  %2602 = vmatpush1.bf16.msra.mxu0 %v4987_v59 }
 0x125   :  { %v409_v4 = vpop.f32.mrb[3].mxu0  ;;  %v450_v5 = vpop.f32.mrb[3].mxu1  ;;  %2684 = vmatpush1.bf16.msra.mxu1 %v4990_v60  ;;  %2603 = vmatprep.subr.bf16.mxu0 %v4995_v39 }
 0x126   :  { %2685 = vmatprep.subr.bf16.mxu1 %v4998_v25 }
 0x128   :  { %2604 = vmatpush1.bf16.msra.mxu0 %v4993_v2 }
 0x129   :  { %2686 = vmatpush1.bf16.msra.mxu1 %v4996_v3  ;;  %2605 = vmatprep.subr.bf16.mxu0 %v5001_v6 }
 0x12a   :  { %2687 = vmatprep.subr.bf16.mxu1 %v5004_v7 }
 0x12c   :  { %2606 = vmatpush1.bf16.msra.mxu0 %v4999_v9 }
 0x12d   :  { %2688 = vmatpush1.bf16.msra.mxu1 %v5002_v10  ;;  %2607 = vmatprep.subr.bf16.mxu0 %v5007_v11  ;;  %v5703_v10 = vsub.s32 0, %v5639_v48 }
 0x12e   :  { %2689 = vmatprep.subr.bf16.mxu1 %v5010_v12 }
 0x130   :  { %2608 = vmatpush1.bf16.msra.mxu0 %v5005_v13 }
 0x131   :  { %2690 = vmatpush1.bf16.msra.mxu1 %v5008_v14  ;;  %2609 = vmatprep.subr.bf16.mxu0 %v5013_v15 }
 0x132   :  { %2691 = vmatprep.subr.bf16.mxu1 %v5016_v16 }
 0x134   :  { %2610 = vmatpush1.bf16.msra.mxu0 %v5011_v17 }
 0x135   :  { %2692 = vmatpush1.bf16.msra.mxu1 %v5014_v18  ;;  %2611 = vmatprep.subr.bf16.mxu0 %v5019_v19 }
 0x136   :  { %2693 = vmatprep.subr.bf16.mxu1 %v5022_v22 }
 0x138   :  { %2612 = vmatpush1.bf16.msra.mxu0 %v5017_v21 }
 0x139   :  { %2694 = vmatpush1.bf16.msra.mxu1 %v5020_v23  ;;  %2613 = vmatprep.subr.bf16.mxu0 %v5025_v24 }
 0x13a   :  { %2695 = vmatprep.subr.bf16.mxu1 %v5028_v28 }
 0x13c   :  { %2614 = vmatpush1.bf16.msra.mxu0 %v5023_v26 }
 0x13d   :  { %2696 = vmatpush1.bf16.msra.mxu1 %v5026_v29  ;;  %2615 = vmatprep.subr.bf16.mxu0 %v5031_v30 }
 0x13e   :  { %2697 = vmatprep.subr.bf16.mxu1 %v5034_v32 }
 0x140   :  { %2616 = vmatpush1.bf16.msra.mxu0 %v5029_v31 }
 0x141   :  { %2698 = vmatpush1.bf16.msra.mxu1 %v5032_v34  ;;  %2617 = vmatprep.subr.bf16.mxu0 %v5037_v35 }
 0x142   :  { %2699 = vmatprep.subr.bf16.mxu1 %v5040_v37  ;;  %v5065_v37 = vld [vmem:[#allocation4 + $0x200] ss:$16 sps:$4 sm:$0xff]  }
 0x144   :  { %2618 = vmatpush1.bf16.msra.mxu0 %v5035_v36 }
 0x145   :  { %2700 = vmatpush1.bf16.msra.mxu1 %v5038_v40  ;;  %2619 = vmatprep.subr.bf16.mxu0 %v5043_v41  ;;  %v5068_v40 = vld [vmem:[#allocation4 + $0x208] ss:$16 sps:$4 sm:$0xff]  }
 0x146   :  { %2701 = vmatprep.subr.bf16.mxu1 %v5046_v43  ;;  %v5073_v43 = vld [vmem:[#allocation4 + $0x224] ss:$16 sps:$4 sm:$0xff]  }
 0x148   :  { %2620 = vmatpush1.bf16.msra.mxu0 %v5041_v42 }
 0x149   :  { %2702 = vmatpush1.bf16.msra.mxu1 %v5044_v44  ;;  %2621 = vmatprep.subr.bf16.mxu0 %v5049_v45  ;;  %v5076_v44 = vld [vmem:[#allocation4 + $0x22c] ss:$16 sps:$4 sm:$0xff]   ;;  %v5074_v45 = vld [vmem:[#allocation4 + $0x228] ss:$16 sps:$4 sm:$0xff]  }
 0x14a   :  { %2703 = vmatprep.subr.bf16.mxu1 %v5052_v20  ;;  %v5077_v20 = vld [vmem:[#allocation4 + $0x240] ss:$16 sps:$4 sm:$0xff]  }
 0x14c   :  { %2622 = vmatpush1.bf16.msra.mxu0 %v5047_v46  ;;  %v5082_v46 = vld [vmem:[#allocation4 + $0x24c] ss:$16 sps:$4 sm:$0xff]  }
 0x14d   :  { %2704 = vmatpush1.bf16.msra.mxu1 %v5050_v47  ;;  %2623 = vmatprep.subr.bf16.mxu0 %v5055_v49  ;;  %v5080_v47 = vld [vmem:[#allocation4 + $0x248] ss:$16 sps:$4 sm:$0xff]   ;;  %v5085_v49 = vld [vmem:[#allocation4 + $0x264] ss:$16 sps:$4 sm:$0xff]  }
 0x14e   :  { %2705 = vmatprep.subr.bf16.mxu1 %v5058_v51  ;;  %v5083_v51 = vld [vmem:[#allocation4 + $0x260] ss:$16 sps:$4 sm:$0xff]  }
 0x150   :  { %2624 = vmatpush1.bf16.msra.mxu0 %v5053_v50  ;;  %v5088_v50 = vld [vmem:[#allocation4 + $0x26c] ss:$16 sps:$4 sm:$0xff]  }
 0x151   :  { %2706 = vmatpush1.bf16.msra.mxu1 %v5056_v52  ;;  %2625 = vmatprep.subr.bf16.mxu0 %v5061_v53  ;;  %v5086_v52 = vld [vmem:[#allocation4 + $0x268] ss:$16 sps:$4 sm:$0xff]   ;;  %v5091_v53 = vld [vmem:[#allocation4 + $0x284] ss:$16 sps:$4 sm:$0xff]  }
 0x152   :  { %2707 = vmatprep.subr.bf16.mxu1 %v5064_v8  ;;  %v5089_v8 = vld [vmem:[#allocation4 + $0x280] ss:$16 sps:$4 sm:$0xff]  }
 0x154   :  { %2626 = vmatpush1.bf16.msra.mxu0 %v5059_v54  ;;  %v5094_v54 = vld [vmem:[#allocation4 + $0x28c] ss:$16 sps:$4 sm:$0xff]  }
 0x155   :  { %2708 = vmatpush1.bf16.msra.mxu1 %v5062_v27  ;;  %2636 = vmatprep.subr.bf16.mxu0 %v5067_v0  ;;  %v5092_v27 = vld [vmem:[#allocation4 + $0x288] ss:$16 sps:$4 sm:$0xff]   ;;  %v5097_v0 = vld [vmem:[#allocation4 + $0x2a4] ss:$16 sps:$4 sm:$0xff]  }
 0x156   :  { %2718 = vmatprep.subr.bf16.mxu1 %v5070_v55  ;;  %v5100_v55 = vld [vmem:[#allocation4 + $0x2ac] ss:$16 sps:$4 sm:$0xff]  }
 0x162   :  { %v1469_v56 = vpop.f32.mrb[4].mxu0  ;;  %v1510_v58 = vpop.f32.mrb[4].mxu1 }
 0x163   :  { %v1470_v57 = vadd.f32 %v1469_v56, %v5692_v38  ;;  %v1471_v59 = vpop.f32.mrb[5].mxu0  ;;  %v1512_v39 = vpop.f32.mrb[5].mxu1  ;;  %v5708_v38 = vld [vmem:[%s5768_s4] sm:$0xf] }
 0x164   :  { %v1472_v60 = vadd.f32 %v1471_v59, %v5696_v62  ;;  %v1473_v25 = vpop.f32.mrb[6].mxu0  ;;  %v1514_v1 = vpop.f32.mrb[6].mxu1  ;;  %v5711_v62 = vsub.s32 1, %v5639_v48  ;;  %v1768_v13 = vrot.slane %v5708_v38, %v5703_v10  ;;  %v5095_v56 = vld [vmem:[#allocation4 + $0x2a0] ss:$16 sps:$4 sm:$0xff]  }
 0x165   :  { %v1511_v33 = vadd.f32 %v1510_v58, %v1470_v57  ;;  %v1474_v2 = vpop.f32.mrb[7].mxu0  ;;  %v1515_v4 = vpop.f32.mrb[7].mxu1  ;;  %v5098_v57 = vld [vmem:[#allocation4 + $0x2a8] ss:$16 sps:$4 sm:$0xff]   ;;  %v5103_v58 = vld [vmem:[#allocation4 + $0x2c4] ss:$16 sps:$4 sm:$0xff]  }
 0x166   :  { %v1513_v3 = vadd.f32 %v1512_v39, %v1472_v60  ;;  %v1772_v16 = vrot.slane %v5708_v38, %v5711_v62  ;;  %v5106_v59 = vld [vmem:[#allocation4 + $0x2cc] ss:$16 sps:$4 sm:$0xff]   ;;  %v5101_v60 = vld [vmem:[#allocation4 + $0x2c0] ss:$16 sps:$4 sm:$0xff]   ;;  %v5104_v39 = vld [vmem:[#allocation4 + $0x2c8] ss:$16 sps:$4 sm:$0xff]  }
 0x167   :  { %v5109_v25 = vld [vmem:[#allocation4 + $0x2e4] ss:$16 sps:$4 sm:$0xff]   ;;  %v5107_v1 = vld [vmem:[#allocation4 + $0x2e0] ss:$16 sps:$4 sm:$0xff]   ;;  %v5110_v2 = vld [vmem:[#allocation4 + $0x2e8] ss:$16 sps:$4 sm:$0xff]  }
 0x168   :  { %v5118_v4 = vld [vmem:[#allocation4 + $0x30c] ss:$16 sps:$4 sm:$0xff]  }
 0x16a   :  { %v1592_v5 = vpop.f32.mrb[8].mxu1 }
 0x16b   :  { %v1594_v6 = vpop.f32.mrb[9].mxu1 }
 0x16c   :  { %v1596_v7 = vpop.f32.mrb[10].mxu1 }
 0x16d   :  { %v1597_v9 = vpop.f32.mrb[11].mxu1  ;;  %v5121_v7 = vld [vmem:[#allocation4 + $0x324] ss:$16 sps:$4 sm:$0xff]  }
 0x16e   :  { %v5124_v9 = vld [vmem:[#allocation4 + $0x32c] ss:$16 sps:$4 sm:$0xff]  }
 0x1a2   :  { %v1551_v11 = vpop.f32.mrb[8].mxu0 }
 0x1a3   :  { %v1552_v12 = vadd.f32 %v1551_v11, %v1511_v33  ;;  %v1553_v14 = vpop.f32.mrb[9].mxu0  ;;  %v5112_v33 = vld [vmem:[#allocation4 + $0x2ec] ss:$16 sps:$4 sm:$0xff]   ;;  %v5119_v11 = vld [vmem:[#allocation4 + $0x320] ss:$16 sps:$4 sm:$0xff]  }
 0x1a4   :  { %v1554_v15 = vadd.f32 %v1553_v14, %v1513_v3  ;;  %v1555_v17 = vpop.f32.mrb[10].mxu0  ;;  %v5115_v3 = vld [vmem:[#allocation4 + $0x304] ss:$16 sps:$4 sm:$0xff]   ;;  %v5130_v14 = vld [vmem:[#allocation4 + $0x34c] ss:$16 sps:$4 sm:$0xff]  }
 0x1a5   :  { %v1593_v18 = vadd.f32 %v1592_v5, %v1552_v12  ;;  %v1556_v19 = vpop.f32.mrb[11].mxu0  ;;  %v5113_v5 = vld [vmem:[#allocation4 + $0x300] ss:$16 sps:$4 sm:$0xff]   ;;  %v5122_v12 = vld [vmem:[#allocation4 + $0x328] ss:$16 sps:$4 sm:$0xff]  }
 0x1a6   :  { %v1595_v21 = vadd.f32 %v1594_v6, %v1554_v15  ;;  %v5116_v6 = vld [vmem:[#allocation4 + $0x308] ss:$16 sps:$4 sm:$0xff]   ;;  %v5125_v15 = vld [vmem:[#allocation4 + $0x340] ss:$16 sps:$4 sm:$0xff]   ;;  %v5133_v17 = vld [vmem:[#allocation4 + $0x364] ss:$16 sps:$4 sm:$0xff]  }
 0x1a7   :  { %v1785_v22 = vadd.f32 %v1768_v13, %v1593_v18  ;;  %v5127_v13 = vld [vmem:[#allocation4 + $0x344] ss:$16 sps:$4 sm:$0xff]   ;;  %v5136_v18 = vld [vmem:[#allocation4 + $0x36c] ss:$16 sps:$4 sm:$0xff]   ;;  %v5131_v19 = vld [vmem:[#allocation4 + $0x360] ss:$16 sps:$4 sm:$0xff]  }
 0x1a8   :  { %v1786_v23 = vadd.f32 %v1772_v16, %v1595_v21  ;;  %v5128_v16 = vld [vmem:[#allocation4 + $0x348] ss:$16 sps:$4 sm:$0xff]  }
 0x1a9   :  { %vm1789_vm1 = vcmp.gt.f32.partialorder %v1785_v22, 0.0  ;;  %v1793_v24 = vmul.f32 0.2, %v1785_v22  ;;  %v5134_v21 = vld [vmem:[#allocation4 + $0x368] ss:$16 sps:$4 sm:$0xff]  }
 0x1aa   :  { %vm1790_vm2 = vcmp.gt.f32.partialorder %v1786_v23, 0.0  ;;  %v1794_v26 = vmul.f32 0.2, %v1786_v23 }
 0x1ab   :  { %v1633_v28 = vpop.f32.mrb[12].mxu1  ;;  %v1797_v29 = vsel %vm1789_vm1, %v1785_v22, %v1793_v24  ;;  %v5139_v22 = vld [vmem:[#allocation4 + $0x384] ss:$16 sps:$4 sm:$0xff]   ;;  %v5137_v24 = vld [vmem:[#allocation4 + $0x380] ss:$16 sps:$4 sm:$0xff]  }
 0x1ac   :  { %v5718_v30 = vadd.f32 %v1633_v28, %v5694_v61  ;;  %v1635_v31 = vpop.f32.mrb[13].mxu1  ;;  %v1798_v32 = vsel %vm1790_vm2, %v1786_v23, %v1794_v26  ;;  %v1801_v42 = vpack.c.bf16 %v1797_v29, %v1797_v29  ;;  %v5071_v61 = vld [vmem:[#allocation4 + $0x220] ss:$16 sps:$4 sm:$0xff]   ;;  %v5142_v23 = vld [vmem:[#allocation4 + $0x38c] ss:$16 sps:$4 sm:$0xff]  }
 0x1ad   :  { %v5721_v34 = vadd.f32 %v1635_v31, %v5698_v63  ;;  %v1637_v35 = vpop.f32.mrb[14].mxu1  ;;  %v1802_v36 = vpack.c.bf16 %v1798_v32, %v1798_v32  ;;  %v5079_v63 = vld [vmem:[#allocation4 + $0x244] ss:$16 sps:$4 sm:$0xff]   ;;  %v5140_v26 = vld [vmem:[#allocation4 + $0x388] ss:$16 sps:$4 sm:$0xff]  }
 0x1ae   :  { %v1638_v41 = vpop.f32.mrb[15].mxu1  ;;  %v5145_v28 = vld [vmem:[#allocation4 + $0x3a4] ss:$16 sps:$4 sm:$0xff]   ;;  %v5148_v29 = vld [vmem:[#allocation4 + $0x3ac] ss:$16 sps:$4 sm:$0xff]  }
 0x1af   :  { %2627 = vmatprep.mubr.bf16.mxu0 %v1802_v36  ;;  %2709 = vmatprep.mubr.bf16.mxu1 %v1802_v36  ;;  %v5143_v31 = vld [vmem:[#allocation4 + $0x3a0] ss:$16 sps:$4 sm:$0xff]   ;;  %v5146_v32 = vld [vmem:[#allocation4 + $0x3a8] ss:$16 sps:$4 sm:$0xff]   ;;  %v5151_v36 = vld [vmem:[#allocation4 + $0x3c4] ss:$16 sps:$4 sm:$0xff]  }
 0x1b0   :  { %2628 = vmatmul.mubr.bf16.vlgmr.msra.gmra.mrb[20].mxu0 %v1801_v42  ;;  %2710 = vmatmul.mubr.bf16.vlgmr.msra.gmra.mrb[20].mxu1 %v1801_v42 }
 0x1b1   :  { %2637 = vmatpush1.bf16.msra.mxu0 %v5065_v37  ;;  %2719 = vmatpush1.bf16.msra.mxu1 %v5068_v40  ;;  %v5154_v37 = vld [vmem:[#allocation4 + $0x3cc] ss:$16 sps:$4 sm:$0xff]  }
 0x1b2   :  { %2638 = vmatprep.subr.bf16.mxu0 %v5073_v43  ;;  %2720 = vmatprep.subr.bf16.mxu1 %v5076_v44 }
 0x1b5   :  { %2639 = vmatpush1.bf16.msra.mxu0 %v5071_v61  ;;  %2721 = vmatpush1.bf16.msra.mxu1 %v5074_v45  ;;  %v5149_v61 = vld [vmem:[#allocation4 + $0x3c0] ss:$16 sps:$4 sm:$0xff]   ;;  %v5152_v45 = vld [vmem:[#allocation4 + $0x3c8] ss:$16 sps:$4 sm:$0xff]  }
 0x1b6   :  { %2640 = vmatprep.subr.bf16.mxu0 %v5079_v63  ;;  %2722 = vmatprep.subr.bf16.mxu1 %v5082_v46  ;;  %v5157_v63 = vld [vmem:[#allocation4 + $0x3e4] ss:$16 sps:$4 sm:$0xff]   ;;  %v5160_v46 = vld [vmem:[#allocation4 + $0x3ec] ss:$16 sps:$4 sm:$0xff]  }
 0x1b9   :  { %2641 = vmatpush1.bf16.msra.mxu0 %v5077_v20  ;;  %2723 = vmatpush1.bf16.msra.mxu1 %v5080_v47  ;;  %v5726_v20 = vsub.s32 2, %v5639_v48  ;;  %v5729_v47 = vsub.s32 3, %v5639_v48 }
 0x1ba   :  { %2642 = vmatprep.subr.bf16.mxu0 %v5085_v49  ;;  %2724 = vmatprep.subr.bf16.mxu1 %v5088_v50  ;;  %v5163_v50 = vld [vmem:[#allocation6 + $0x4] ss:$16 sps:$4 sm:$0xff]  }
 0x1bd   :  { %2643 = vmatpush1.bf16.msra.mxu0 %v5083_v51  ;;  %2725 = vmatpush1.bf16.msra.mxu1 %v5086_v52  ;;  %v5166_v51 = vld [vmem:[#allocation6 + $0xc] ss:$16 sps:$4 sm:$0xff]  }
 0x1be   :  { %2644 = vmatprep.subr.bf16.mxu0 %v5091_v53  ;;  %2726 = vmatprep.subr.bf16.mxu1 %v5094_v54 }
 0x1c1   :  { %2645 = vmatpush1.bf16.msra.mxu0 %v5089_v8  ;;  %2727 = vmatpush1.bf16.msra.mxu1 %v5092_v27  ;;  %v1776_v27 = vrot.slane %v5708_v38, %v5726_v20 }
 0x1c2   :  { %2646 = vmatprep.subr.bf16.mxu0 %v5097_v0  ;;  %2728 = vmatprep.subr.bf16.mxu1 %v5100_v55 }
 0x1c5   :  { %2647 = vmatpush1.bf16.msra.mxu0 %v5095_v56  ;;  %2729 = vmatpush1.bf16.msra.mxu1 %v5098_v57  ;;  %v1780_v56 = vrot.slane %v5708_v38, %v5729_v47 }
 0x1c6   :  { %2648 = vmatprep.subr.bf16.mxu0 %v5103_v58  ;;  %2730 = vmatprep.subr.bf16.mxu1 %v5106_v59 }
 0x1c9   :  { %2649 = vmatpush1.bf16.msra.mxu0 %v5101_v60  ;;  %2731 = vmatpush1.bf16.msra.mxu1 %v5104_v39 }
 0x1ca   :  { %2650 = vmatprep.subr.bf16.mxu0 %v5109_v25  ;;  %2732 = vmatprep.subr.bf16.mxu1 %v5112_v33 }
 0x1cd   :  { %2651 = vmatpush1.bf16.msra.mxu0 %v5107_v1  ;;  %2733 = vmatpush1.bf16.msra.mxu1 %v5110_v2 }
 0x1ce   :  { %2652 = vmatprep.subr.bf16.mxu0 %v5115_v3  ;;  %2734 = vmatprep.subr.bf16.mxu1 %v5118_v4 }
 0x1d1   :  { %2653 = vmatpush1.bf16.msra.mxu0 %v5113_v5  ;;  %2735 = vmatpush1.bf16.msra.mxu1 %v5116_v6  ;;  %v5161_v5 = vld [vmem:[#allocation6] ss:$16 sps:$4 sm:$0xff]   ;;  %v5164_v6 = vld [vmem:[#allocation6 + $0x8] ss:$16 sps:$4 sm:$0xff]  }
 0x1d2   :  { %2654 = vmatprep.subr.bf16.mxu0 %v5121_v7  ;;  %2736 = vmatprep.subr.bf16.mxu1 %v5124_v9  ;;  %v5169_v7 = vld [vmem:[#allocation6 + $0x24] ss:$16 sps:$4 sm:$0xff]   ;;  %v5172_v9 = vld [vmem:[#allocation6 + $0x2c] ss:$16 sps:$4 sm:$0xff]  }
 0x1d5   :  { %2655 = vmatpush1.bf16.msra.mxu0 %v5119_v11  ;;  %2737 = vmatpush1.bf16.msra.mxu1 %v5122_v12  ;;  %v5167_v11 = vld [vmem:[#allocation6 + $0x20] ss:$16 sps:$4 sm:$0xff]   ;;  %v5170_v12 = vld [vmem:[#allocation6 + $0x28] ss:$16 sps:$4 sm:$0xff]  }
 0x1d6   :  { %2656 = vmatprep.subr.bf16.mxu0 %v5127_v13  ;;  %2738 = vmatprep.subr.bf16.mxu1 %v5130_v14  ;;  %v5175_v13 = vld [vmem:[#allocation6 + $0x44] ss:$16 sps:$4 sm:$0xff]   ;;  %v5178_v14 = vld [vmem:[#allocation6 + $0x4c] ss:$16 sps:$4 sm:$0xff]  }
 0x1d9   :  { %2657 = vmatpush1.bf16.msra.mxu0 %v5125_v15  ;;  %2739 = vmatpush1.bf16.msra.mxu1 %v5128_v16  ;;  %v5173_v15 = vld [vmem:[#allocation6 + $0x40] ss:$16 sps:$4 sm:$0xff]   ;;  %v5176_v16 = vld [vmem:[#allocation6 + $0x48] ss:$16 sps:$4 sm:$0xff]  }
 0x1da   :  { %2658 = vmatprep.subr.bf16.mxu0 %v5133_v17  ;;  %2740 = vmatprep.subr.bf16.mxu1 %v5136_v18  ;;  %v5181_v17 = vld [vmem:[#allocation6 + $0x64] ss:$16 sps:$4 sm:$0xff]   ;;  %v5184_v18 = vld [vmem:[#allocation6 + $0x6c] ss:$16 sps:$4 sm:$0xff]  }
 0x1dd   :  { %2659 = vmatpush1.bf16.msra.mxu0 %v5131_v19  ;;  %2741 = vmatpush1.bf16.msra.mxu1 %v5134_v21  ;;  %v5179_v19 = vld [vmem:[#allocation6 + $0x60] ss:$16 sps:$4 sm:$0xff]   ;;  %v5182_v21 = vld [vmem:[#allocation6 + $0x68] ss:$16 sps:$4 sm:$0xff]  }
 0x1de   :  { %2660 = vmatprep.subr.bf16.mxu0 %v5139_v22  ;;  %2742 = vmatprep.subr.bf16.mxu1 %v5142_v23  ;;  %v5187_v22 = vld [vmem:[#allocation6 + $0x84] ss:$16 sps:$4 sm:$0xff]   ;;  %v5190_v23 = vld [vmem:[#allocation6 + $0x8c] ss:$16 sps:$4 sm:$0xff]  }
 0x1e1   :  { %2661 = vmatpush1.bf16.msra.mxu0 %v5137_v24  ;;  %2743 = vmatpush1.bf16.msra.mxu1 %v5140_v26  ;;  %v5185_v24 = vld [vmem:[#allocation6 + $0x80] ss:$16 sps:$4 sm:$0xff]   ;;  %v5188_v26 = vld [vmem:[#allocation6 + $0x88] ss:$16 sps:$4 sm:$0xff]  }
 0x1e2   :  { %v1674_v35 = vpop.f32.mrb[12].mxu0  ;;  %2662 = vmatprep.subr.bf16.mxu0 %v5145_v28  ;;  %2744 = vmatprep.subr.bf16.mxu1 %v5148_v29  ;;  %v5193_v28 = vld [vmem:[#allocation6 + $0xa4] ss:$16 sps:$4 sm:$0xff]   ;;  %v5196_v29 = vld [vmem:[#allocation6 + $0xac] ss:$16 sps:$4 sm:$0xff]  }
 0x1e3   :  { %v1675_v40 = vadd.f32 %v1674_v35, %v5718_v30  ;;  %v1676_v41 = vpop.f32.mrb[13].mxu0  ;;  %v5155_v30 = vld [vmem:[#allocation4 + $0x3e0] ss:$16 sps:$4 sm:$0xff]   ;;  %v5199_v35 = vld [vmem:[#allocation6 + $0xc4] ss:$16 sps:$4 sm:$0xff]  }
 0x1e4   :  { %v1677_v42 = vadd.f32 %v1676_v41, %v5721_v34  ;;  %v1678_v43 = vpop.f32.mrb[14].mxu0  ;;  %v5158_v34 = vld [vmem:[#allocation4 + $0x3e8] ss:$16 sps:$4 sm:$0xff]   ;;  %v5205_v41 = vld [vmem:[#allocation6 + $0xe4] ss:$16 sps:$4 sm:$0xff]  }
 0x1e5   :  { %v1679_v44 = vpop.f32.mrb[15].mxu0  ;;  %2663 = vmatpush1.bf16.msra.mxu0 %v5143_v31  ;;  %2745 = vmatpush1.bf16.msra.mxu1 %v5146_v32  ;;  %v5191_v31 = vld [vmem:[#allocation6 + $0xa0] ss:$16 sps:$4 sm:$0xff]   ;;  %v5194_v32 = vld [vmem:[#allocation6 + $0xa8] ss:$16 sps:$4 sm:$0xff]  }
 0x1e6   :  { %2664 = vmatprep.subr.bf16.mxu0 %v5151_v36  ;;  %2746 = vmatprep.subr.bf16.mxu1 %v5154_v37  ;;  %v5202_v36 = vld [vmem:[#allocation6 + $0xcc] ss:$16 sps:$4 sm:$0xff]   ;;  %v5197_v37 = vld [vmem:[#allocation6 + $0xc0] ss:$16 sps:$4 sm:$0xff]   ;;  %v5206_v44 = vld [vmem:[#allocation6 + $0xe8] ss:$16 sps:$4 sm:$0xff]  }
 0x1e7   :  { %v5203_v43 = vld [vmem:[#allocation6 + $0xe0] ss:$16 sps:$4 sm:$0xff]  }
 0x1e9   :  { %2665 = vmatpush1.bf16.msra.mxu0 %v5149_v61  ;;  %2747 = vmatpush1.bf16.msra.mxu1 %v5152_v45  ;;  %v5211_v61 = vld [vmem:[#allocation6 + $0x104] ss:$16 sps:$4 sm:$0xff]   ;;  %v5214_v45 = vld [vmem:[#allocation6 + $0x10c] ss:$16 sps:$4 sm:$0xff]  }
 0x1ea   :  { %v1756_v49 = vpop.f32.mrb[16].mxu0  ;;  %2666 = vmatprep.subr.bf16.mxu0 %v5157_v63  ;;  %2748 = vmatprep.subr.bf16.mxu1 %v5160_v46  ;;  %v5209_v63 = vld [vmem:[#allocation6 + $0x100] ss:$16 sps:$4 sm:$0xff]   ;;  %v5212_v46 = vld [vmem:[#allocation6 + $0x108] ss:$16 sps:$4 sm:$0xff]  }
 0x1eb   :  { %v1715_v52 = vpop.f32.mrb[16].mxu1  ;;  %v1758_v53 = vpop.f32.mrb[17].mxu0 }
 0x1ec   :  { %v1716_v54 = vadd.f32 %v1715_v52, %v1675_v40  ;;  %v1717_v8 = vpop.f32.mrb[17].mxu1  ;;  %v1760_v0 = vpop.f32.mrb[18].mxu0  ;;  %v5200_v40 = vld [vmem:[#allocation6 + $0xc8] ss:$16 sps:$4 sm:$0xff]   ;;  %v5226_v52 = vld [vmem:[#allocation6 + $0x14c] ss:$16 sps:$4 sm:$0xff]  }
 0x1ed   :  { %v1718_v55 = vadd.f32 %v1717_v8, %v1677_v42  ;;  %v1719_v48 = vpop.f32.mrb[18].mxu1  ;;  %v1761_v57 = vpop.f32.mrb[19].mxu0  ;;  %2667 = vmatpush1.bf16.msra.mxu0 %v5155_v30  ;;  %2749 = vmatpush1.bf16.msra.mxu1 %v5158_v34  ;;  %v5208_v42 = vld [vmem:[#allocation6 + $0xec] ss:$16 sps:$4 sm:$0xff]   ;;  %v5217_v30 = vld [vmem:[#allocation6 + $0x124] ss:$16 sps:$4 sm:$0xff]  }
 0x1ee   :  { %v1757_v58 = vadd.f32 %v1756_v49, %v1716_v54  ;;  %v1720_v59 = vpop.f32.mrb[19].mxu1  ;;  %3565 = vmatprep.subr.bf16.mxu0 %v5163_v50  ;;  %3647 = vmatprep.subr.bf16.mxu1 %v5166_v51  ;;  %v5220_v34 = vld [vmem:[#allocation6 + $0x12c] ss:$16 sps:$4 sm:$0xff]   ;;  %v5215_v49 = vld [vmem:[#allocation6 + $0x120] ss:$16 sps:$4 sm:$0xff]  }
 0x1ef   :  { %v1759_v60 = vadd.f32 %v1758_v53, %v1718_v55  ;;  %v5218_v50 = vld [vmem:[#allocation6 + $0x128] ss:$16 sps:$4 sm:$0xff]   ;;  %v5223_v51 = vld [vmem:[#allocation6 + $0x144] ss:$16 sps:$4 sm:$0xff]   ;;  %v5221_v53 = vld [vmem:[#allocation6 + $0x140] ss:$16 sps:$4 sm:$0xff]  }
 0x1f0   :  { %v1787_v39 = vadd.f32 %v1776_v27, %v1757_v58  ;;  %v5224_v54 = vld [vmem:[#allocation6 + $0x148] ss:$16 sps:$4 sm:$0xff]   ;;  %v5229_v8 = vld [vmem:[#allocation6 + $0x164] ss:$16 sps:$4 sm:$0xff]   ;;  %v5232_v27 = vld [vmem:[#allocation6 + $0x16c] ss:$16 sps:$4 sm:$0xff]  }
 0x1f1   :  { %v1788_v25 = vadd.f32 %v1780_v56, %v1759_v60  ;;  %v5227_v0 = vld [vmem:[#allocation6 + $0x160] ss:$16 sps:$4 sm:$0xff]   ;;  %v5230_v55 = vld [vmem:[#allocation6 + $0x168] ss:$16 sps:$4 sm:$0xff]   ;;  %v5235_v48 = vld [vmem:[#allocation6 + $0x184] ss:$16 sps:$4 sm:$0xff]  }
 0x1f2   :  { %vm1791_vm3 = vcmp.gt.f32.partialorder %v1787_v39, 0.0  ;;  %v1795_v33 = vmul.f32 0.2, %v1787_v39  ;;  %v5238_v56 = vld [vmem:[#allocation6 + $0x18c] ss:$16 sps:$4 sm:$0xff]  }
 0x1f3   :  { %v1796_v1 = vmul.f32 0.2, %v1788_v25  ;;  %vm1792_vm4 = vcmp.gt.f32.partialorder %v1788_v25, 0.0  ;;  %v5233_v57 = vld [vmem:[#allocation6 + $0x180] ss:$16 sps:$4 sm:$0xff]  }
 0x1f4   :  { %v1799_v2 = vsel %vm1791_vm3, %v1787_v39, %v1795_v33  ;;  %v5236_v58 = vld [vmem:[#allocation6 + $0x188] ss:$16 sps:$4 sm:$0xff]   ;;  %v5241_v59 = vld [vmem:[#allocation6 + $0x1a4] ss:$16 sps:$4 sm:$0xff]   ;;  %v5244_v60 = vld [vmem:[#allocation6 + $0x1ac] ss:$16 sps:$4 sm:$0xff]  }
 0x1f5   :  { %v1800_v3 = vsel %vm1792_vm4, %v1788_v25, %v1796_v1  ;;  %v1803_v38 = vpack.c.bf16 %v1799_v2, %v1799_v2  ;;  %v5239_v39 = vld [vmem:[#allocation6 + $0x1a0] ss:$16 sps:$4 sm:$0xff]   ;;  %v5242_v25 = vld [vmem:[#allocation6 + $0x1a8] ss:$16 sps:$4 sm:$0xff]   ;;  %v5247_v33 = vld [vmem:[#allocation6 + $0x1c4] ss:$16 sps:$4 sm:$0xff]  }
 0x1f6   :  { %v1804_v4 = vpack.c.bf16 %v1800_v3, %v1800_v3  ;;  %v5250_v1 = vld [vmem:[#allocation6 + $0x1cc] ss:$16 sps:$4 sm:$0xff]   ;;  %v5245_v2 = vld [vmem:[#allocation6 + $0x1c0] ss:$16 sps:$4 sm:$0xff]   ;;  %v5248_v3 = vld [vmem:[#allocation6 + $0x1c8] ss:$16 sps:$4 sm:$0xff]  }
 0x1f8   :  { %2668 = vmatprep.mubr.bf16.mxu0 %v1804_v4  ;;  %2750 = vmatprep.mubr.bf16.mxu1 %v1804_v4  ;;  %v5253_v4 = vld [vmem:[#allocation6 + $0x1e4] ss:$16 sps:$4 sm:$0xff]  }
 0x1f9   :  { %2669 = vmatmul.mubr.bf16.vlgmr.msra.gmra.mrb[20].mxu0 %v1803_v38  ;;  %2751 = vmatmul.mubr.bf16.vlgmr.msra.gmra.mrb[20].mxu1 %v1803_v38  ;;  %v5254_v38 = vld [vmem:[#allocation6 + $0x1e8] ss:$16 sps:$4 sm:$0xff]  }
 0x1fa   :  { %3566 = vmatpush1.bf16.msra.mxu0 %v5161_v5  ;;  %3648 = vmatpush1.bf16.msra.mxu1 %v5164_v6  ;;  %v5256_v5 = vld [vmem:[#allocation6 + $0x1ec] ss:$16 sps:$4 sm:$0xff]   ;;  %v5251_v6 = vld [vmem:[#allocation6 + $0x1e0] ss:$16 sps:$4 sm:$0xff]  }
 0x1fb   :  { %3567 = vmatprep.subr.bf16.mxu0 %v5169_v7  ;;  %3649 = vmatprep.subr.bf16.mxu1 %v5172_v9  ;;  %v5259_v7 = vld [vmem:[#allocation6 + $0x204] ss:$16 sps:$4 sm:$0xff]   ;;  %v5262_v9 = vld [vmem:[#allocation6 + $0x20c] ss:$16 sps:$4 sm:$0xff]  }
 0x1fe   :  { %3568 = vmatpush1.bf16.msra.mxu0 %v5167_v11  ;;  %3650 = vmatpush1.bf16.msra.mxu1 %v5170_v12  ;;  %v5738_v11 = vld [vmem:[%s5770_s6] sm:$0xf] }
 0x1ff   :  { %3569 = vmatprep.subr.bf16.mxu0 %v5175_v13  ;;  %3651 = vmatprep.subr.bf16.mxu1 %v5178_v14  ;;  %v1938_v12 = vrot.slane %v5738_v11, %v5703_v10  ;;  %v1942_v13 = vrot.slane %v5738_v11, %v5711_v62  ;;  %v1950_v14 = vrot.slane %v5738_v11, %v5729_v47 }
 0x202   :  { %3570 = vmatpush1.bf16.msra.mxu0 %v5173_v15  ;;  %3652 = vmatpush1.bf16.msra.mxu1 %v5176_v16 }
 0x203   :  { %3571 = vmatprep.subr.bf16.mxu0 %v5181_v17  ;;  %3653 = vmatprep.subr.bf16.mxu1 %v5184_v18 }
 0x206   :  { %3572 = vmatpush1.bf16.msra.mxu0 %v5179_v19  ;;  %3654 = vmatpush1.bf16.msra.mxu1 %v5182_v21 }
 0x207   :  { %3573 = vmatprep.subr.bf16.mxu0 %v5187_v22  ;;  %3655 = vmatprep.subr.bf16.mxu1 %v5190_v23 }
 0x20a   :  { %3574 = vmatpush1.bf16.msra.mxu0 %v5185_v24  ;;  %3656 = vmatpush1.bf16.msra.mxu1 %v5188_v26 }
 0x20b   :  { %3575 = vmatprep.subr.bf16.mxu0 %v5193_v28  ;;  %3657 = vmatprep.subr.bf16.mxu1 %v5196_v29 }
 0x20e   :  { %3576 = vmatpush1.bf16.msra.mxu0 %v5191_v31  ;;  %3658 = vmatpush1.bf16.msra.mxu1 %v5194_v32 }
 0x20f   :  { %3577 = vmatprep.subr.bf16.mxu0 %v5199_v35  ;;  %3659 = vmatprep.subr.bf16.mxu1 %v5202_v36 }
 0x212   :  { %3578 = vmatpush1.bf16.msra.mxu0 %v5197_v37  ;;  %3660 = vmatpush1.bf16.msra.mxu1 %v5200_v40  ;;  %v5257_v40 = vld [vmem:[#allocation6 + $0x200] ss:$16 sps:$4 sm:$0xff]  }
 0x213   :  { %3579 = vmatprep.subr.bf16.mxu0 %v5205_v41  ;;  %3661 = vmatprep.subr.bf16.mxu1 %v5208_v42  ;;  %v5260_v41 = vld [vmem:[#allocation6 + $0x208] ss:$16 sps:$4 sm:$0xff]  }
 0x216   :  { %3580 = vmatpush1.bf16.msra.mxu0 %v5203_v43  ;;  %3662 = vmatpush1.bf16.msra.mxu1 %v5206_v44  ;;  %v5265_v44 = vld [vmem:[#allocation6 + $0x224] ss:$16 sps:$4 sm:$0xff]  }
 0x217   :  { %3581 = vmatprep.subr.bf16.mxu0 %v5211_v61  ;;  %3663 = vmatprep.subr.bf16.mxu1 %v5214_v45  ;;  %v5268_v61 = vld [vmem:[#allocation6 + $0x22c] ss:$16 sps:$4 sm:$0xff]  }
 0x21a   :  { %3582 = vmatpush1.bf16.msra.mxu0 %v5209_v63  ;;  %3664 = vmatpush1.bf16.msra.mxu1 %v5212_v46  ;;  %v5263_v63 = vld [vmem:[#allocation6 + $0x220] ss:$16 sps:$4 sm:$0xff]   ;;  %v5266_v46 = vld [vmem:[#allocation6 + $0x228] ss:$16 sps:$4 sm:$0xff]  }
 0x21b   :  { %3583 = vmatprep.subr.bf16.mxu0 %v5217_v30  ;;  %3665 = vmatprep.subr.bf16.mxu1 %v5220_v34  ;;  %v5271_v30 = vld [vmem:[#allocation6 + $0x244] ss:$16 sps:$4 sm:$0xff]   ;;  %v5274_v34 = vld [vmem:[#allocation6 + $0x24c] ss:$16 sps:$4 sm:$0xff]  }
 0x21e   :  { %3584 = vmatpush1.bf16.msra.mxu0 %v5215_v49  ;;  %3666 = vmatpush1.bf16.msra.mxu1 %v5218_v50  ;;  %v5269_v49 = vld [vmem:[#allocation6 + $0x240] ss:$16 sps:$4 sm:$0xff]   ;;  %v5272_v50 = vld [vmem:[#allocation6 + $0x248] ss:$16 sps:$4 sm:$0xff]  }
 0x21f   :  { %3585 = vmatprep.subr.bf16.mxu0 %v5223_v51  ;;  %3667 = vmatprep.subr.bf16.mxu1 %v5226_v52  ;;  %v5277_v51 = vld [vmem:[#allocation6 + $0x264] ss:$16 sps:$4 sm:$0xff]   ;;  %v5280_v52 = vld [vmem:[#allocation6 + $0x26c] ss:$16 sps:$4 sm:$0xff]  }
 0x222   :  { %3586 = vmatpush1.bf16.msra.mxu0 %v5221_v53  ;;  %3668 = vmatpush1.bf16.msra.mxu1 %v5224_v54  ;;  %v5275_v53 = vld [vmem:[#allocation6 + $0x260] ss:$16 sps:$4 sm:$0xff]   ;;  %v5278_v54 = vld [vmem:[#allocation6 + $0x268] ss:$16 sps:$4 sm:$0xff]  }
 0x223   :  { %3587 = vmatprep.subr.bf16.mxu0 %v5229_v8  ;;  %3669 = vmatprep.subr.bf16.mxu1 %v5232_v27  ;;  %v5283_v8 = vld [vmem:[#allocation6 + $0x284] ss:$16 sps:$4 sm:$0xff]   ;;  %v5286_v27 = vld [vmem:[#allocation6 + $0x28c] ss:$16 sps:$4 sm:$0xff]  }
 0x226   :  { %3588 = vmatpush1.bf16.msra.mxu0 %v5227_v0  ;;  %3670 = vmatpush1.bf16.msra.mxu1 %v5230_v55  ;;  %v5281_v0 = vld [vmem:[#allocation6 + $0x280] ss:$16 sps:$4 sm:$0xff]   ;;  %v5284_v55 = vld [vmem:[#allocation6 + $0x288] ss:$16 sps:$4 sm:$0xff]  }
 0x227   :  { %3589 = vmatprep.subr.bf16.mxu0 %v5235_v48  ;;  %3671 = vmatprep.subr.bf16.mxu1 %v5238_v56  ;;  %v5289_v48 = vld [vmem:[#allocation6 + $0x2a4] ss:$16 sps:$4 sm:$0xff]   ;;  %v5292_v56 = vld [vmem:[#allocation6 + $0x2ac] ss:$16 sps:$4 sm:$0xff]  }
 0x22a   :  { %3590 = vmatpush1.bf16.msra.mxu0 %v5233_v57  ;;  %3672 = vmatpush1.bf16.msra.mxu1 %v5236_v58  ;;  %v5287_v57 = vld [vmem:[#allocation6 + $0x2a0] ss:$16 sps:$4 sm:$0xff]   ;;  %v5290_v58 = vld [vmem:[#allocation6 + $0x2a8] ss:$16 sps:$4 sm:$0xff]  }
 0x22b   :  { %3591 = vmatprep.subr.bf16.mxu0 %v5241_v59  ;;  %3673 = vmatprep.subr.bf16.mxu1 %v5244_v60  ;;  %v5295_v59 = vld [vmem:[#allocation6 + $0x2c4] ss:$16 sps:$4 sm:$0xff]   ;;  %v5298_v60 = vld [vmem:[#allocation6 + $0x2cc] ss:$16 sps:$4 sm:$0xff]  }
 0x22e   :  { %3592 = vmatpush1.bf16.msra.mxu0 %v5239_v39  ;;  %3674 = vmatpush1.bf16.msra.mxu1 %v5242_v25  ;;  %v5293_v39 = vld [vmem:[#allocation6 + $0x2c0] ss:$16 sps:$4 sm:$0xff]   ;;  %v5296_v25 = vld [vmem:[#allocation6 + $0x2c8] ss:$16 sps:$4 sm:$0xff]  }
 0x22f   :  { %3593 = vmatprep.subr.bf16.mxu0 %v5247_v33  ;;  %3675 = vmatprep.subr.bf16.mxu1 %v5250_v1  ;;  %v5301_v33 = vld [vmem:[#allocation6 + $0x2e4] ss:$16 sps:$4 sm:$0xff]   ;;  %v5304_v1 = vld [vmem:[#allocation6 + $0x2ec] ss:$16 sps:$4 sm:$0xff]  }
 0x232   :  { %3594 = vmatpush1.bf16.msra.mxu0 %v5245_v2  ;;  %3676 = vmatpush1.bf16.msra.mxu1 %v5248_v3  ;;  %v5299_v2 = vld [vmem:[#allocation6 + $0x2e0] ss:$16 sps:$4 sm:$0xff]   ;;  %v5302_v3 = vld [vmem:[#allocation6 + $0x2e8] ss:$16 sps:$4 sm:$0xff]  }
 0x233   :  { %3595 = vmatprep.subr.bf16.mxu0 %v5253_v4  ;;  %3677 = vmatprep.subr.bf16.mxu1 %v5256_v5  ;;  %v5307_v4 = vld [vmem:[#allocation6 + $0x304] ss:$16 sps:$4 sm:$0xff]   ;;  %v5310_v5 = vld [vmem:[#allocation6 + $0x30c] ss:$16 sps:$4 sm:$0xff]  }
 0x236   :  { %3596 = vmatpush1.bf16.msra.mxu0 %v5251_v6  ;;  %3678 = vmatpush1.bf16.msra.mxu1 %v5254_v38  ;;  %v5305_v6 = vld [vmem:[#allocation6 + $0x300] ss:$16 sps:$4 sm:$0xff]   ;;  %v5308_v38 = vld [vmem:[#allocation6 + $0x308] ss:$16 sps:$4 sm:$0xff]  }
 0x237   :  { %3606 = vmatprep.subr.bf16.mxu0 %v5259_v7  ;;  %3688 = vmatprep.subr.bf16.mxu1 %v5262_v9  ;;  %v5313_v7 = vld [vmem:[#allocation6 + $0x324] ss:$16 sps:$4 sm:$0xff]   ;;  %v5316_v9 = vld [vmem:[#allocation6 + $0x32c] ss:$16 sps:$4 sm:$0xff]  }
 0x2cc   :  { %v2670_v15 = vpop.f32.mrb[20].mxu0  ;;  %v5746_v16 = vpop.f32.mrb[20].mxu1 }
 0x2cd   :  { %v4633_v17 = vadd.f32 %v2670_v15, %v1938_v12  ;;  %v2672_v18 = vpop.f32.mrb[21].mxu0  ;;  %v2754_v19 = vpop.f32.mrb[21].mxu1  ;;  %v5311_v12 = vld [vmem:[#allocation6 + $0x320] ss:$16 sps:$4 sm:$0xff]   ;;  %v5322_v15 = vld [vmem:[#allocation6 + $0x34c] ss:$16 sps:$4 sm:$0xff]  }
 0x2ce   :  { %v4634_v21 = vadd.f32 %v2672_v18, %v1942_v13  ;;  %v4636_v22 = vadd.f32 %v2754_v19, %v1950_v14  ;;  %v2674_v23 = vpop.f32.mrb[22].mxu0  ;;  %v2756_v24 = vpop.f32.mrb[22].mxu1  ;;  %v5314_v13 = vld [vmem:[#allocation6 + $0x328] ss:$16 sps:$4 sm:$0xff]   ;;  %v5319_v14 = vld [vmem:[#allocation6 + $0x344] ss:$16 sps:$4 sm:$0xff]  }
 0x2cf   :  { %vm2759_vm5 = vcmp.gt.f32.partialorder %v4633_v17, 0.0  ;;  %v2763_v26 = vmul.f32 0.2, %v4633_v17  ;;  %v2675_v32 = vpop.f32.mrb[23].mxu0  ;;  %v2757_v35 = vpop.f32.mrb[23].mxu1 }
 0x2d0   :  { %vm2760_vm6 = vcmp.gt.f32.partialorder %v4634_v21, 0.0  ;;  %v2764_v28 = vmul.f32 0.2, %v4634_v21  ;;  %vm2762_vm7 = vcmp.gt.f32.partialorder %v4636_v22, 0.0  ;;  %v2766_v29 = vmul.f32 0.2, %v4636_v22 }
 0x2d1   :  { %v2767_v31 = vsel %vm2759_vm5, %v4633_v17, %v2763_v26  ;;  %v5317_v17 = vld [vmem:[#allocation6 + $0x340] ss:$16 sps:$4 sm:$0xff]   ;;  %v5320_v18 = vld [vmem:[#allocation6 + $0x348] ss:$16 sps:$4 sm:$0xff]   ;;  %v5325_v19 = vld [vmem:[#allocation6 + $0x364] ss:$16 sps:$4 sm:$0xff]   ;;  %v1946_v35 = vrot.slane %v5738_v11, %v5726_v20 }
 0x2d2   :  { %v2768_v36 = vsel %vm2760_vm6, %v4634_v21, %v2764_v28  ;;  %v2770_v42 = vsel %vm2762_vm7, %v4636_v22, %v2766_v29  ;;  %v2771_v43 = vpack.c.bf16 %v2767_v31, %v2767_v31  ;;  %v5328_v21 = vld [vmem:[#allocation6 + $0x36c] ss:$16 sps:$4 sm:$0xff]   ;;  %v5323_v22 = vld [vmem:[#allocation6 + $0x360] ss:$16 sps:$4 sm:$0xff]   ;;  %v5326_v23 = vld [vmem:[#allocation6 + $0x368] ss:$16 sps:$4 sm:$0xff]  }
 0x2d3   :  { %v2772_v37 = vpack.c.bf16 %v2768_v36, %v2768_v36  ;;  %v2774_v45 = vpack.c.bf16 %v2770_v42, %v2770_v42  ;;  %v5331_v24 = vld [vmem:[#allocation6 + $0x384] ss:$16 sps:$4 sm:$0xff]   ;;  %v5334_v26 = vld [vmem:[#allocation6 + $0x38c] ss:$16 sps:$4 sm:$0xff]   ;;  %v5329_v28 = vld [vmem:[#allocation6 + $0x380] ss:$16 sps:$4 sm:$0xff]   ;;  %v4635_v42 = vadd.f32 %v5746_v16, %v1946_v35 }
 0x2d4   :  { %v5332_v29 = vld [vmem:[#allocation6 + $0x388] ss:$16 sps:$4 sm:$0xff]   ;;  %v5337_v31 = vld [vmem:[#allocation6 + $0x3a4] ss:$16 sps:$4 sm:$0xff]   ;;  %v5340_v32 = vld [vmem:[#allocation6 + $0x3ac] ss:$16 sps:$4 sm:$0xff]  }
 0x2d5   :  { %3597 = vmatprep.mubr.bf16.mxu0 %v2772_v37  ;;  %3679 = vmatprep.mubr.bf16.mxu1 %v2772_v37  ;;  %v5335_v36 = vld [vmem:[#allocation6 + $0x3a0] ss:$16 sps:$4 sm:$0xff]   ;;  %v5338_v37 = vld [vmem:[#allocation6 + $0x3a8] ss:$16 sps:$4 sm:$0xff]   ;;  %vm2761_vm8 = vcmp.gt.f32.partialorder %v4635_v42, 0.0 }
 0x2d6   :  { %3598 = vmatmul.mubr.bf16.vlgmr.msra.gmra.mrb[24].mxu0 %v2771_v43  ;;  %3680 = vmatmul.mubr.bf16.vlgmr.msra.gmra.mrb[24].mxu1 %v2771_v43  ;;  %v5341_v43 = vld [vmem:[#allocation6 + $0x3c0] ss:$16 sps:$4 sm:$0xff]  }
 0x2d7   :  { %3607 = vmatpush1.bf16.msra.mxu0 %v5257_v40  ;;  %3689 = vmatpush1.bf16.msra.mxu1 %v5260_v41  ;;  %v5343_v40 = vld [vmem:[#allocation6 + $0x3c4] ss:$16 sps:$4 sm:$0xff]   ;;  %v5346_v41 = vld [vmem:[#allocation6 + $0x3cc] ss:$16 sps:$4 sm:$0xff]   ;;  %v5347_v11 = vld [vmem:[#allocation6 + $0x3e0] ss:$16 sps:$4 sm:$0xff]  }
 0x2d8   :  { %3638 = vmatprep.mubr.bf16.mxu0 %v2774_v45  ;;  %3720 = vmatprep.mubr.bf16.mxu1 %v2774_v45  ;;  %v5352_v45 = vld [vmem:[#allocation6 + $0x3ec] ss:$16 sps:$4 sm:$0xff]   ;;  %v5355_v16 = vld [vmem:[#allocation7] sm:$0xff]  }
 0x2d9   :  { %3608 = vmatprep.subr.bf16.mxu0 %v5265_v44  ;;  %3690 = vmatprep.subr.bf16.mxu1 %v5268_v61  ;;  %v5344_v44 = vld [vmem:[#allocation6 + $0x3c8] ss:$16 sps:$4 sm:$0xff]   ;;  %v5349_v61 = vld [vmem:[#allocation6 + $0x3e4] ss:$16 sps:$4 sm:$0xff]  }
 0x2db   :  { %3609 = vmatpush1.bf16.msra.mxu0 %v5263_v63  ;;  %3691 = vmatpush1.bf16.msra.mxu1 %v5266_v46  ;;  %v2765_v63 = vmul.f32 0.2, %v4635_v42  ;;  %v5350_v46 = vld [vmem:[#allocation6 + $0x3e8] ss:$16 sps:$4 sm:$0xff]  }
 0x2dc   :  { %3610 = vmatprep.subr.bf16.mxu0 %v5271_v30  ;;  %3692 = vmatprep.subr.bf16.mxu1 %v5274_v34  ;;  %v5353_v30 = vld [vmem:[#allocation7 + $0x40] sm:$0xff]  }
 0x2dd   :  { %v5354_v34 = vld [vmem:[#allocation7 + $0xc0] sm:$0xff]  }
 0x2df   :  { %3611 = vmatpush1.bf16.msra.mxu0 %v5269_v49  ;;  %3693 = vmatpush1.bf16.msra.mxu1 %v5272_v50  ;;  %v2769_v49 = vsel %vm2761_vm8, %v4635_v42, %v2765_v63  ;;  %v5356_v50 = vld [vmem:[#allocation7 + $0x80] sm:$0xff]  }
 0x2e0   :  { %3612 = vmatprep.subr.bf16.mxu0 %v5277_v51  ;;  %3694 = vmatprep.subr.bf16.mxu1 %v5280_v52  ;;  %v2773_v51 = vpack.c.bf16 %v2769_v49, %v2769_v49  ;;  %v5357_v52 = vld [vmem:[#allocation7 + $0x48] sm:$0xff]  }
 0x2e3   :  { %3613 = vmatpush1.bf16.msra.mxu0 %v5275_v53  ;;  %3695 = vmatpush1.bf16.msra.mxu1 %v5278_v54  ;;  %v5358_v53 = vld [vmem:[#allocation7 + $0xc8] sm:$0xff]  }
 0x2e4   :  { %3614 = vmatprep.subr.bf16.mxu0 %v5283_v8  ;;  %3696 = vmatprep.subr.bf16.mxu1 %v5286_v27  ;;  %v5359_v54 = vld [vmem:[#allocation7 + $0x8] sm:$0xff]   ;;  %v5361_v27 = vld [vmem:[#allocation7 + $0x50] sm:$0xff]  }
 0x2e5   :  { %v5360_v8 = vld [vmem:[#allocation7 + $0x88] sm:$0xff]  }
 0x2e7   :  { %3615 = vmatpush1.bf16.msra.mxu0 %v5281_v0  ;;  %3697 = vmatpush1.bf16.msra.mxu1 %v5284_v55  ;;  %v5362_v0 = vld [vmem:[#allocation7 + $0xd0] sm:$0xff]  }
 0x2e8   :  { %3616 = vmatprep.subr.bf16.mxu0 %v5289_v48  ;;  %3698 = vmatprep.subr.bf16.mxu1 %v5292_v56  ;;  %v5363_v55 = vld [vmem:[#allocation7 + $0x10] sm:$0xff]   ;;  %v5365_v56 = vld [vmem:[#allocation7 + $0x58] sm:$0xff]  }
 0x2e9   :  { %v5364_v48 = vld [vmem:[#allocation7 + $0x90] sm:$0xff]  }
 0x2eb   :  { %3617 = vmatpush1.bf16.msra.mxu0 %v5287_v57  ;;  %3699 = vmatpush1.bf16.msra.mxu1 %v5290_v58  ;;  %v5366_v57 = vld [vmem:[#allocation7 + $0xd8] sm:$0xff]  }
 0x2ec   :  { %3618 = vmatprep.subr.bf16.mxu0 %v5295_v59  ;;  %3700 = vmatprep.subr.bf16.mxu1 %v5298_v60  ;;  %v5367_v58 = vld [vmem:[#allocation7 + $0x18] sm:$0xff]   ;;  %v5369_v60 = vld [vmem:[#allocation7 + $0x60] sm:$0xff]  }
 0x2ed   :  { %v5368_v59 = vld [vmem:[#allocation7 + $0x98] sm:$0xff]  }
 0x2ef   :  { %3619 = vmatpush1.bf16.msra.mxu0 %v5293_v39  ;;  %3701 = vmatpush1.bf16.msra.mxu1 %v5296_v25  ;;  %v5370_v39 = vld [vmem:[#allocation7 + $0xe0] sm:$0xff]  }
 0x2f0   :  { %3620 = vmatprep.subr.bf16.mxu0 %v5301_v33  ;;  %3702 = vmatprep.subr.bf16.mxu1 %v5304_v1  ;;  %v5371_v25 = vld [vmem:[#allocation7 + $0x20] sm:$0xff]   ;;  %v5373_v1 = vld [vmem:[#allocation7 + $0x68] sm:$0xff]  }
 0x2f1   :  { %v5372_v33 = vld [vmem:[#allocation7 + $0xa0] sm:$0xff]  }
 0x2f3   :  { %3621 = vmatpush1.bf16.msra.mxu0 %v5299_v2  ;;  %3703 = vmatpush1.bf16.msra.mxu1 %v5302_v3  ;;  %v5374_v2 = vld [vmem:[#allocation7 + $0xe8] sm:$0xff]  }
 0x2f4   :  { %3622 = vmatprep.subr.bf16.mxu0 %v5307_v4  ;;  %3704 = vmatprep.subr.bf16.mxu1 %v5310_v5  ;;  %v5375_v3 = vld [vmem:[#allocation7 + $0x28] sm:$0xff]   ;;  %v5377_v5 = vld [vmem:[#allocation7 + $0x70] sm:$0xff]  }
 0x2f5   :  { %v5376_v4 = vld [vmem:[#allocation7 + $0xa8] sm:$0xff]  }
 0x2f7   :  { %3623 = vmatpush1.bf16.msra.mxu0 %v5305_v6  ;;  %3705 = vmatpush1.bf16.msra.mxu1 %v5308_v38  ;;  %v5378_v6 = vld [vmem:[#allocation7 + $0xf0] sm:$0xff]  }
 0x2f8   :  { %3624 = vmatprep.subr.bf16.mxu0 %v5313_v7  ;;  %3706 = vmatprep.subr.bf16.mxu1 %v5316_v9  ;;  %v5379_v38 = vld [vmem:[#allocation7 + $0x30] sm:$0xff]   ;;  %v5381_v9 = vld [vmem:[#allocation7 + $0x78] sm:$0xff]  }
 0x2f9   :  { %v5380_v7 = vld [vmem:[#allocation7 + $0xb0] sm:$0xff]  }
 0x2fb   :  { %3625 = vmatpush1.bf16.msra.mxu0 %v5311_v12  ;;  %3707 = vmatpush1.bf16.msra.mxu1 %v5314_v13  ;;  %v5382_v12 = vld [vmem:[#allocation7 + $0xf8] sm:$0xff]  }
 0x2fc   :  { %3626 = vmatprep.subr.bf16.mxu0 %v5319_v14  ;;  %3708 = vmatprep.subr.bf16.mxu1 %v5322_v15  ;;  %v5383_v13 = vld [vmem:[#allocation7 + $0x38] sm:$0xff]   ;;  %v2903_v15 = vld [vmem:[%s5772_s8] sm:$0xf] }
 0x2fd   :  { %v5384_v14 = vld [vmem:[#allocation7 + $0xb8] sm:$0xff]  }
 0x2ff   :  { %3627 = vmatpush1.bf16.msra.mxu0 %v5317_v17  ;;  %3709 = vmatpush1.bf16.msra.mxu1 %v5320_v18  ;;  %v2908_v17 = vrot.slane %v2903_v15, %v5703_v10  ;;  %v2916_v18 = vrot.slane %v2903_v15, %v5726_v20 }
 0x300   :  { %3628 = vmatprep.subr.bf16.mxu0 %v5325_v19  ;;  %3710 = vmatprep.subr.bf16.mxu1 %v5328_v21  ;;  %v2912_v19 = vrot.slane %v2903_v15, %v5711_v62  ;;  %v2920_v21 = vrot.slane %v2903_v15, %v5729_v47 }
 0x303   :  { %3629 = vmatpush1.bf16.msra.mxu0 %v5323_v22  ;;  %3711 = vmatpush1.bf16.msra.mxu1 %v5326_v23 }
 0x304   :  { %3630 = vmatprep.subr.bf16.mxu0 %v5331_v24  ;;  %3712 = vmatprep.subr.bf16.mxu1 %v5334_v26 }
 0x307   :  { %3631 = vmatpush1.bf16.msra.mxu0 %v5329_v28  ;;  %3713 = vmatpush1.bf16.msra.mxu1 %v5332_v29 }
 0x308   :  { %3632 = vmatprep.subr.bf16.mxu0 %v5337_v31  ;;  %3714 = vmatprep.subr.bf16.mxu1 %v5340_v32 }
 0x30b   :  { %3633 = vmatpush1.bf16.msra.mxu0 %v5335_v36  ;;  %3715 = vmatpush1.bf16.msra.mxu1 %v5338_v37 }
 0x30c   :  { %3634 = vmatprep.subr.bf16.mxu0 %v5343_v40  ;;  %3716 = vmatprep.subr.bf16.mxu1 %v5346_v41 }
 0x30f   :  { %3635 = vmatpush1.bf16.msra.mxu0 %v5341_v43  ;;  %3717 = vmatpush1.bf16.msra.mxu1 %v5344_v44 }
 0x310   :  { %3636 = vmatprep.subr.bf16.mxu0 %v5349_v61  ;;  %3718 = vmatprep.subr.bf16.mxu1 %v5352_v45 }
 0x313   :  { %3637 = vmatpush1.bf16.msra.mxu0 %v5347_v11  ;;  %3719 = vmatpush1.bf16.msra.mxu1 %v5350_v46 }
 0x314   :  { %4589 = vmatprep.subr.bf16.mxu0 %v5353_v30  ;;  %4611 = vmatprep.subr.bf16.mxu1 %v5354_v34  ;;  %v4556_v34 = vld [vmem:[%s5774_s10] ss:$0 sm:$0xff] }
 0x316   :  { %3639 = vmatmul.mubr.bf16.vlgmr.msra.gmra.mrb[24].mxu0 %v2773_v51  ;;  %3721 = vmatmul.mubr.bf16.vlgmr.msra.gmra.mrb[24].mxu1 %v2773_v51 }
 0x317   :  { %4590 = vmatpush3.bf16.msra.mxu0 %v5355_v16  ;;  %4612 = vmatpush3.bf16.msra.mxu1 %v5356_v50 }
 0x318   :  { %4591 = vmatprep.subr.bf16.mxu0 %v5357_v52  ;;  %4613 = vmatprep.subr.bf16.mxu1 %v5358_v53 }
 0x31b   :  { %4592 = vmatpush3.bf16.msra.mxu0 %v5359_v54  ;;  %4614 = vmatpush3.bf16.msra.mxu1 %v5360_v8 }
 0x31c   :  { %4593 = vmatprep.subr.bf16.mxu0 %v5361_v27  ;;  %4615 = vmatprep.subr.bf16.mxu1 %v5362_v0 }
 0x31f   :  { %4594 = vmatpush3.bf16.msra.mxu0 %v5363_v55  ;;  %4616 = vmatpush3.bf16.msra.mxu1 %v5364_v48 }
 0x320   :  { %4595 = vmatprep.subr.bf16.mxu0 %v5365_v56  ;;  %4617 = vmatprep.subr.bf16.mxu1 %v5366_v57 }
 0x323   :  { %4596 = vmatpush3.bf16.msra.mxu0 %v5367_v58  ;;  %4618 = vmatpush3.bf16.msra.mxu1 %v5368_v59 }
 0x324   :  { %4597 = vmatprep.subr.bf16.mxu0 %v5369_v60  ;;  %4619 = vmatprep.subr.bf16.mxu1 %v5370_v39 }
 0x327   :  { %4598 = vmatpush3.bf16.msra.mxu0 %v5371_v25  ;;  %4620 = vmatpush3.bf16.msra.mxu1 %v5372_v33 }
 0x328   :  { %4599 = vmatprep.subr.bf16.mxu0 %v5373_v1  ;;  %4621 = vmatprep.subr.bf16.mxu1 %v5374_v2 }
 0x32b   :  { %4600 = vmatpush3.bf16.msra.mxu0 %v5375_v3  ;;  %4622 = vmatpush3.bf16.msra.mxu1 %v5376_v4 }
 0x32c   :  { %4601 = vmatprep.subr.bf16.mxu0 %v5377_v5  ;;  %4623 = vmatprep.subr.bf16.mxu1 %v5378_v6 }
 0x32f   :  { %4602 = vmatpush3.bf16.msra.mxu0 %v5379_v38  ;;  %4624 = vmatpush3.bf16.msra.mxu1 %v5380_v7 }
 0x330   :  { %4603 = vmatprep.subr.bf16.mxu0 %v5381_v9  ;;  %4625 = vmatprep.subr.bf16.mxu1 %v5382_v12 }
 0x333   :  { %4604 = vmatpush3.bf16.msra.mxu0 %v5383_v13  ;;  %4626 = vmatpush3.bf16.msra.mxu1 %v5384_v14 }
 0x3e9   :  { %v3640_v22 = vpop.f32.mrb[24].mxu0  ;;  %v3722_v23 = vpop.f32.mrb[24].mxu1 }
 0x3ea   :  { %v4637_v24 = vadd.f32 %v3640_v22, %v2908_v17  ;;  %v4639_v26 = vadd.f32 %v3722_v23, %v2916_v18  ;;  %v3642_v28 = vpop.f32.mrb[25].mxu0  ;;  %v3724_v29 = vpop.f32.mrb[25].mxu1 }
 0x3eb   :  { %v4638_v31 = vadd.f32 %v3642_v28, %v2912_v19  ;;  %v4640_v32 = vadd.f32 %v3724_v29, %v2920_v21  ;;  %v3644_v35 = vpop.f32.mrb[26].mxu0  ;;  %v3726_v36 = vpop.f32.mrb[26].mxu1 }
 0x3ec   :  { %vm3729_vm9 = vcmp.gt.f32.partialorder %v4637_v24, 0.0  ;;  %v3733_v37 = vmul.f32 0.2, %v4637_v24  ;;  %vm3731_vm10 = vcmp.gt.f32.partialorder %v4639_v26, 0.0  ;;  %v3735_v10 = vmul.f32 0.2, %v4639_v26 }
 0x3ed   :  { %vm3730_vm11 = vcmp.gt.f32.partialorder %v4638_v31, 0.0  ;;  %v3734_v20 = vmul.f32 0.2, %v4638_v31  ;;  %vm3732_vm12 = vcmp.gt.f32.partialorder %v4640_v32, 0.0  ;;  %v3736_v62 = vmul.f32 0.2, %v4640_v32 }
 0x3ee   :  { %v3737_v40 = vsel %vm3729_vm9, %v4637_v24, %v3733_v37  ;;  %v3739_v47 = vsel %vm3731_vm10, %v4639_v26, %v3735_v10  ;;  %v3645_v41 = vpop.f32.mrb[27].mxu0  ;;  %v3727_v42 = vpop.f32.mrb[27].mxu1 }
 0x3ef   :  { %v3738_v43 = vsel %vm3730_vm11, %v4638_v31, %v3734_v20  ;;  %v3740_v44 = vsel %vm3732_vm12, %v4640_v32, %v3736_v62  ;;  %v3741_v63 = vpack.c.bf16 %v3737_v40, %v3737_v40  ;;  %v3743_v11 = vpack.c.bf16 %v3739_v47, %v3739_v47 }
 0x3f0   :  { %v3742_v61 = vpack.c.bf16 %v3738_v43, %v3738_v43  ;;  %v3744_v45 = vpack.c.bf16 %v3740_v44, %v3740_v44 }
 0x3f2   :  { %4040 = vmatprep.mubr.bf16.mxu0 %v3742_v61  ;;  %4080 = vmatprep.mubr.bf16.mxu1 %v3744_v45 }
 0x3f3   :  { %4041 = vmatmul.mubr.bf16.vlgmr.msra.gmra.mrb[28].mxu0 %v3741_v63  ;;  %4081 = vmatmul.mubr.bf16.vlgmr.msra.gmra.mrb[28].mxu1 %v3743_v11 }
 0x4c6   :  { %v4605_v46 = vpop.f32.mrb[28].mxu0  ;;  %v4627_v30 = vpop.f32.mrb[28].mxu1 }
 0x4c7   :  { %v4606_v49 = vpop.f32.mrb[29].mxu0  ;;  %v4628_v16 = vpop.f32.mrb[29].mxu1 }
 0x4c8   :  { %v4607_v50 = vadd.f32 %v4606_v49, %v4605_v46  ;;  %v4629_v51 = vadd.f32 %v4628_v16, %v4627_v30  ;;  %v4608_v52 = vpop.f32.mrb[30].mxu0  ;;  %v4630_v53 = vpop.f32.mrb[30].mxu1 }
 0x4c9   :  { %v4609_v54 = vpop.f32.mrb[31].mxu0  ;;  %v4631_v8 = vpop.f32.mrb[31].mxu1 }
 0x4ca   :  { %v4043_v27 = vadd.f32 %v4607_v50, %v4556_v34 }
 0x4cc   :  { %v4083_v0 = vadd.f32 %v4629_v51, %v4043_v27 }
 0x4ce   :  { %4088 = vst [vmem:[%s5775_s11] sm:$0x3] %v4083_v0 }
 0x4cf   :  { %4093 = vsyncpa [#allocation3], 1 }
 0x4d0   :  { %4094 = vsyncpa [#allocation5], 1 }
 0x4d1   :  { %4095 = vsyncpa [#allocation8], 1 }

</bundles_post_ra>
